<compile_context>
chip_gen: v5e
topology: v5e:2x2
jax: 0.10.0
libtpu: 0.0.40
codegen_flags: <defaults>
</compile_context>

<pallas_src>
import functools
import math

import jax
import jax.numpy as jnp
from jax.experimental import pallas as pl
from jax.experimental.pallas import tpu as pltpu


def _round_up(x: int, m: int) -> int:
    return (x + m - 1) // m * m


# Per-buffer VMEM budget for the resident (folded) input slab; used only to
# pick how many taps get folded into the contraction dimension.
_SLAB_BYTES_BUDGET = 10 * 1024 * 1024


def _make_conv_kernel(deltas, tm, cin_tap, act):
    """Fused conv kernel for a fixed tuple of flat row offsets (outer taps)."""

    def kernel(x_ref, w_ref, b_ref, o_ref, acc_ref):
        # x_ref:  (l_slab, cin_tap * 1)   whole folded slab, this batch elem
        # w_ref:  (len(deltas)*cin_tap, Cout_pad)
        # b_ref:  (1, Cout_pad)           float32
        # o_ref:  (tm, Cout_pad)
        # acc_ref:(tm, Cout_pad)          float32 scratch
        i = pl.program_id(1)
        base = pl.multiple_of(i * tm, tm)
        for t, delta in enumerate(deltas):          # static unroll over kD taps
            xs = x_ref[pl.ds(base + delta, tm), :]                # (tm, cin_tap)
            wk = w_ref[pl.ds(t * cin_tap, cin_tap), :]            # (cin_tap, Cout_pad)
            prod = jnp.dot(xs, wk, preferred_element_type=jnp.float32)
            if t == 0:
                acc_ref[...] = prod                 # first tap writes (no zero fill)
            else:
                acc_ref[...] += prod
        res = acc_ref[...] + b_ref[...]
        if act == "relu":
            res = jnp.maximum(res, 0.0)
        elif act == "leaky_relu":
            res = jnp.where(res >= 0.0, res, 0.01 * res)
        o_ref[...] = res.astype(o_ref.dtype)

    return kernel


@functools.partial(jax.jit,
                   static_argnames=("stride", "padding", "tm",
                                    "compute_dtype", "act"))
def conv3d_block_forward(x, weight, bias, *, stride=(1, 1, 1),
                         padding=(0, 0, 0), tm=1024, compute_dtype=None,
                         act=None):
    """
    x:      (N, Cin, D, H, W)     -- PyTorch NCDHW
    weight: (Cout, Cin, kD, kH, kW)
    bias:   (Cout,)
    returns (N, Cout, Do, Ho, Wo)
    """
    N, Cin, D, H, W = x.shape
    Cout, _, kD, kH, kW = weight.shape
    pD, pH, pW = padding
    if tuple(stride) != (1, 1, 1):
        # TODO(synk): stride != 1 needs strided row gathers; module default is 1.
        raise NotImplementedError("fused conv3d kernel supports stride=1 only")

    Dp, Hp, Wp = D + 2 * pD, H + 2 * pH, W + 2 * pW
    Do, Ho, Wo = Dp - kD + 1, Hp - kH + 1, Wp - kW + 1

    S = Hp * Wp
    S8 = _round_up(S, 8)                  # 8-aligned per-depth-slice row stride

    c_pad = _round_up(Cout, 128)          # lane-dense output / weight N dim
    l_out = Do * S8                       # outputs on the padded (h, w) lattice
    tm = min(tm, _round_up(l_out, 8))
    l_out_pad = _round_up(l_out, tm)

    in_itemsize = (jnp.dtype(compute_dtype).itemsize
                   if compute_dtype is not None else x.dtype.itemsize)

    # Candidate tap foldings (inner shifts folded into channels, outer deltas
    # stay as row shifts inside the kernel), most aggressive first.
    candidates = (
        # fold kH*kW -> contraction = kH*kW*Cin, kD outer taps (8-aligned deltas)
        ([b * Wp + c for b in range(kH) for c in range(kW)],
         [a * S8 for a in range(kD)]),
        # fold kW    -> contraction = kW*Cin, kD*kH outer taps
        ([c for c in range(kW)],
         [a * S8 + b * Wp for a in range(kD) for b in range(kH)]),
        # no fold    -> contraction = Cin, kD*kH*kW outer taps
        ([0],
         [a * S8 + b * Wp + c
          for a in range(kD) for b in range(kH) for c in range(kW)]),
    )
    shifts, deltas = candidates[-1]
    for sh, dl in candidates:
        if (l_out_pad + max(dl)) * len(sh) * Cin * in_itemsize <= _SLAB_BYTES_BUDGET:
            shifts, deltas = sh, dl
            break

    cin_eff = len(shifts) * Cin
    l_slab = l_out_pad + max(deltas)      # rows of the folded, VMEM-resident slab
    l_base = l_slab + max(shifts)         # rows needed in the base (unfolded) slab

    # NCDHW -> NDHWC, zero pad ('zeros' padding_mode), 8-align each depth
    # slice, flatten spatial dims.
    x_cl = jnp.transpose(x, (0, 2, 3, 4, 1))
    xp = jnp.pad(x_cl, ((0, 0), (pD, pD), (pH, pH), (pW, pW), (0, 0)))
    xp = jnp.pad(xp.reshape(N, Dp, S, Cin),
                 ((0, 0), (0, 0), (0, S8 - S), (0, 0)))
    xf = xp.reshape(N, Dp * S8, Cin)
    xf = jnp.pad(xf, ((0, 0), (0, l_base - Dp * S8), (0, 0)))

    # Fold inner taps into channels: xcat[n, r, j*Cin:(j+1)*Cin] = xf[n, r+shifts[j], :]
    if len(shifts) == 1:
        xcat = xf[:, :l_slab, :]
    else:
        xcat = jnp.concatenate([xf[:, s:s + l_slab, :] for s in shifts], axis=-1)

    # weight (Cout, Cin, kD, kH, kW) -> (kD, kH, kW, Cin, Cout) -> (K, Cout_pad);
    # the (a, b, c, ci)-major row order matches delta/shift enumeration order.
    kc = kD * kH * kW * Cin
    w_mat = jnp.transpose(weight, (2, 3, 4, 1, 0)).reshape(kc, Cout)
    w_mat = jnp.pad(w_mat, ((0, 0), (0, c_pad - Cout)))
    b_mat = jnp.pad(bias.astype(jnp.float32).reshape(1, Cout),
                    ((0, 0), (0, c_pad - Cout)))

    if compute_dtype is not None:         # e.g. jnp.bfloat16 for full MXU rate
        xcat = xcat.astype(compute_dtype)
        w_mat = w_mat.astype(compute_dtype)

    out_dtype = x.dtype
    grid = (N, l_out_pad // tm)
    kernel = _make_conv_kernel(tuple(deltas), tm, cin_eff, act)

    cost = pl.CostEstimate(
        flops=2 * N * l_out_pad * kc * c_pad,
        transcendentals=0,
        bytes_accessed=(xcat.size * xcat.dtype.itemsize
                        + w_mat.size * w_mat.dtype.itemsize
                        + b_mat.size * 4
                        + N * l_out_pad * c_pad * jnp.dtype(out_dtype).itemsize),
    )

    out = pl.pallas_call(
        kernel,
        out_shape=jax.ShapeDtypeStruct((N, l_out_pad, c_pad), out_dtype),
        grid_spec=pltpu.PrefetchScalarGridSpec(
            num_scalar_prefetch=0,
            grid=grid,
            in_specs=[
                # Whole folded slab for batch element n; its block index does
                # not depend on i, so it stays VMEM-resident across all M tiles
                # of that element.
                pl.BlockSpec((None, l_slab, cin_eff), lambda n, i: (n, 0, 0)),
                pl.BlockSpec((kc, c_pad), lambda n, i: (0, 0)),   # resident weights
                pl.BlockSpec((1, c_pad), lambda n, i: (0, 0)),    # bias row
            ],
            out_specs=pl.BlockSpec((None, tm, c_pad), lambda n, i: (n, i, 0)),
            scratch_shapes=[pltpu.VMEM((tm, c_pad), jnp.float32)],
        ),
        compiler_params=pltpu.CompilerParams(
            dimension_semantics=("parallel", "parallel"),
            vmem_limit_bytes=32 * 1024 * 1024,
        ),
        cost_estimate=cost,
    )(xcat, w_mat, b_mat)

    # Lane-dense padded (N, l_out_pad, c_pad) -> valid rows/channels -> NCDHW.
    # TODO(synk): a channels-last consumer could skip this final layout change.
    out = out[:, :l_out, :Cout].reshape(N, Do, S8, Cout)[:, :, :S, :]
    out = out.reshape(N, Do, Hp, Wp, Cout)[:, :, :Ho, :Wo, :]
    return jnp.transpose(out, (0, 4, 1, 2, 3))


if __name__ == "__main__":
    # Small shapes: batch=2, in_channels=4, out_channels=8, spatial 8^3,
    # kernel_size=3, stride=1, padding=1 (same-size conv).
    N, Cin, Cout = 2, 4, 8
    D = H = W = 8
    k = 3

    key = jax.random.PRNGKey(0)
    kx, kw, kb = jax.random.split(key, 3)

    x = jax.random.normal(kx, (N, Cin, D, H, W), dtype=jnp.float32)
    # Kaiming-normal-ish deterministic init (fan_out, leaky_relu a=0.01).
    fan_out = Cout * k * k * k
    gain = math.sqrt(2.0 / (1.0 + 0.01 ** 2))
    std = gain / math.sqrt(fan_out)
    weight = std * jax.random.normal(kw, (Cout, Cin, k, k, k), dtype=jnp.float32)
    bias = 0.1 * jax.random.normal(kb, (Cout,), dtype=jnp.float32)

    out = conv3d_block_forward(x, weight, bias,
                               stride=(1, 1, 1), padding=(1, 1, 1))
    out = jax.block_until_ready(out)

    # Reference check against XLA's conv (same semantics as nn.Conv3d).
    ref = jax.lax.conv_general_dilated(
        x, weight, window_strides=(1, 1, 1), padding=[(1, 1)] * 3,
        dimension_numbers=("NCDHW", "OIDHW", "NCDHW"),
    ) + bias.reshape(1, Cout, 1, 1, 1)

    assert out.shape == (N, Cout, D, H, W), out.shape
    assert jnp.allclose(out, ref, atol=1e-4, rtol=1e-4)

    print("KERNEL_OK")
</pallas_src>

<mosaic_0001>
module attributes {stable_mosaic.version = 11 : i64} {
  func.func @kernel(%arg0: i32, %arg1: i32, %arg2: memref<1x1040x36xf32, #tpu.memory_space<vmem>>, %arg3: memref<108x128xf32, #tpu.memory_space<vmem>>, %arg4: memref<1x128xf32, #tpu.memory_space<vmem>>, %arg5: memref<1x832x128xf32, #tpu.memory_space<vmem>>, %arg6: memref<832x128xf32, #tpu.memory_space<vmem>>) attributes {dimension_semantics = [#tpu.dimension_semantics<parallel>, #tpu.dimension_semantics<parallel>], iteration_bounds = array<i64: 2, 1>, scalar_prefetch = 0 : i64, scratch_operands = 1 : i64, tpu.core_type = #tpu.core_type<tc>, window_params = [{transform_indices = @transform_0, window_bounds = array<i64: 1, 1040, 36>}, {pipeline_mode = #tpu.pipeline_mode<synchronous>, transform_indices = @transform_1, window_bounds = array<i64: 108, 128>}, {pipeline_mode = #tpu.pipeline_mode<synchronous>, transform_indices = @transform_2, window_bounds = array<i64: 1, 128>}, {transform_indices = @transform_3, window_bounds = array<i64: 1, 832, 128>}]} {
    %c832_i32 = arith.constant 832 : i32
    %0 = arith.muli %arg1, %c832_i32 : i32
    %1 = tpu.assume_multiple %0, 832 : i32
    %c0_i32 = arith.constant 0 : i32
    %2 = arith.addi %1, %c0_i32 : i32
    %c0 = arith.constant 0 : index
    %3 = arith.index_cast %2 : i32 to index
    %c0_0 = arith.constant 0 : index
    %4 = vector.load %arg2[%c0, %3, %c0_0] : memref<1x1040x36xf32, #tpu.memory_space<vmem>>, vector<1x832x36xf32>
    %5 = vector.shape_cast %4 : vector<1x832x36xf32> to vector<832x36xf32>
    %c0_1 = arith.constant 0 : index
    %c0_2 = arith.constant 0 : index
    %6 = vector.load %arg3[%c0_1, %c0_2] : memref<108x128xf32, #tpu.memory_space<vmem>>, vector<36x128xf32>
    %cst = arith.constant dense<0.000000e+00> : vector<832x128xf32>
    %7 = tpu.matmul %5, %6, %cst {dimension_numbers = #tpu.dot_dimension_numbers<[1], [0], [0], [1], [0, 0, 1, 1], [], []>} : vector<832x36xf32>, vector<36x128xf32>, vector<832x128xf32> -> vector<832x128xf32>
    %c0_3 = arith.constant 0 : index
    %c0_4 = arith.constant 0 : index
    %8 = vector.load %arg6[%c0_3, %c0_4] : memref<832x128xf32, #tpu.memory_space<vmem>>, vector<832x128xf32>
    tpu.vector_store %arg6[%c0_3, %c0_4], %7 {strides = array<i32>} : memref<832x128xf32, #tpu.memory_space<vmem>>, vector<832x128xf32>,
    %c104_i32 = arith.constant 104 : i32
    %9 = arith.addi %1, %c104_i32 : i32
    %c0_5 = arith.constant 0 : index
    %10 = arith.index_cast %9 : i32 to index
    %c0_6 = arith.constant 0 : index
    %11 = vector.load %arg2[%c0_5, %10, %c0_6] : memref<1x1040x36xf32, #tpu.memory_space<vmem>>, vector<1x832x36xf32>
    %12 = vector.shape_cast %11 : vector<1x832x36xf32> to vector<832x36xf32>
    %c36 = arith.constant 36 : index
    %c0_7 = arith.constant 0 : index
    %13 = vector.load %arg3[%c36, %c0_7] : memref<108x128xf32, #tpu.memory_space<vmem>>, vector<36x128xf32>
    %cst_8 = arith.constant dense<0.000000e+00> : vector<832x128xf32>
    %14 = tpu.matmul %12, %13, %cst_8 {dimension_numbers = #tpu.dot_dimension_numbers<[1], [0], [0], [1], [0, 0, 1, 1], [], []>} : vector<832x36xf32>, vector<36x128xf32>, vector<832x128xf32> -> vector<832x128xf32>
    %c0_9 = arith.constant 0 : index
    %c0_10 = arith.constant 0 : index
    %15 = vector.load %arg6[%c0_9, %c0_10] : memref<832x128xf32, #tpu.memory_space<vmem>>, vector<832x128xf32>
    %16 = arith.addf %15, %14 : vector<832x128xf32>
    %c0_11 = arith.constant 0 : index
    %c0_12 = arith.constant 0 : index
    %17 = vector.load %arg6[%c0_11, %c0_12] : memref<832x128xf32, #tpu.memory_space<vmem>>, vector<832x128xf32>
    tpu.vector_store %arg6[%c0_11, %c0_12], %16 {strides = array<i32>} : memref<832x128xf32, #tpu.memory_space<vmem>>, vector<832x128xf32>,
    %c208_i32 = arith.constant 208 : i32
    %18 = arith.addi %1, %c208_i32 : i32
    %c0_13 = arith.constant 0 : index
    %19 = arith.index_cast %18 : i32 to index
    %c0_14 = arith.constant 0 : index
    %20 = vector.load %arg2[%c0_13, %19, %c0_14] : memref<1x1040x36xf32, #tpu.memory_space<vmem>>, vector<1x832x36xf32>
    %21 = vector.shape_cast %20 : vector<1x832x36xf32> to vector<832x36xf32>
    %c72 = arith.constant 72 : index
    %c0_15 = arith.constant 0 : index
    %22 = vector.load %arg3[%c72, %c0_15] : memref<108x128xf32, #tpu.memory_space<vmem>>, vector<36x128xf32>
    %cst_16 = arith.constant dense<0.000000e+00> : vector<832x128xf32>
    %23 = tpu.matmul %21, %22, %cst_16 {dimension_numbers = #tpu.dot_dimension_numbers<[1], [0], [0], [1], [0, 0, 1, 1], [], []>} : vector<832x36xf32>, vector<36x128xf32>, vector<832x128xf32> -> vector<832x128xf32>
    %c0_17 = arith.constant 0 : index
    %c0_18 = arith.constant 0 : index
    %24 = vector.load %arg6[%c0_17, %c0_18] : memref<832x128xf32, #tpu.memory_space<vmem>>, vector<832x128xf32>
    %25 = arith.addf %24, %23 : vector<832x128xf32>
    %c0_19 = arith.constant 0 : index
    %c0_20 = arith.constant 0 : index
    %26 = vector.load %arg6[%c0_19, %c0_20] : memref<832x128xf32, #tpu.memory_space<vmem>>, vector<832x128xf32>
    tpu.vector_store %arg6[%c0_19, %c0_20], %25 {strides = array<i32>} : memref<832x128xf32, #tpu.memory_space<vmem>>, vector<832x128xf32>,
    %c0_21 = arith.constant 0 : index
    %c0_22 = arith.constant 0 : index
    %27 = vector.load %arg6[%c0_21, %c0_22] : memref<832x128xf32, #tpu.memory_space<vmem>>, vector<832x128xf32>
    %c0_23 = arith.constant 0 : index
    %c0_24 = arith.constant 0 : index
    %28 = vector.load %arg4[%c0_23, %c0_24] : memref<1x128xf32, #tpu.memory_space<vmem>>, vector<1x128xf32>
    %29 = vector.broadcast %28 : vector<1x128xf32> to vector<832x128xf32>
    %30 = arith.addf %27, %29 : vector<832x128xf32>
    %c0_25 = arith.constant 0 : index
    %c0_26 = arith.constant 0 : index
    %c0_27 = arith.constant 0 : index
    %31 = vector.load %arg5[%c0_25, %c0_26, %c0_27] : memref<1x832x128xf32, #tpu.memory_space<vmem>>, vector<1x832x128xf32>
    %32 = vector.shape_cast %31 : vector<1x832x128xf32> to vector<832x128xf32>
    %33 = vector.shape_cast %30 : vector<832x128xf32> to vector<1x832x128xf32>
    tpu.vector_store %arg5[%c0_25, %c0_26, %c0_27], %33 {strides = array<i32>} : memref<1x832x128xf32, #tpu.memory_space<vmem>>, vector<1x832x128xf32>,
    return
  }
  func.func @transform_0(%arg0: i32, %arg1: i32) -> (i32, i32, i32) {
    %c0_i32 = arith.constant 0 : i32
    %c0_i32_0 = arith.constant 0 : i32
    %c0_i32_1 = arith.constant 0 : i32
    return %arg0, %c0_i32, %c0_i32_0 : i32, i32, i32
  }
  func.func @transform_1(%arg0: i32, %arg1: i32) -> (i32, i32) {
    %c0_i32 = arith.constant 0 : i32
    %c0_i32_0 = arith.constant 0 : i32
    %c0_i32_1 = arith.constant 0 : i32
    return %c0_i32, %c0_i32_0 : i32, i32
  }
  func.func @transform_2(%arg0: i32, %arg1: i32) -> (i32, i32) {
    %c0_i32 = arith.constant 0 : i32
    %c0_i32_0 = arith.constant 0 : i32
    %c0_i32_1 = arith.constant 0 : i32
    return %c0_i32, %c0_i32_0 : i32, i32
  }
  func.func @transform_3(%arg0: i32, %arg1: i32) -> (i32, i32, i32) {
    %c0_i32 = arith.constant 0 : i32
    %c0_i32_0 = arith.constant 0 : i32
    return %arg0, %arg1, %c0_i32 : i32, i32, i32
  }
}

</mosaic_0001>

<bundles_post_ra>
// kernel: conv3d_block_forward.1
= control target key start
LH: loop header
LB: loop body
LE: loop exit
PB: predicated region body
PF: predicated region fallthrough
CT: control target
= control target key end

     0   :  { %s4214_s12 = smov 0   ;;  %s4216_s13 = smov 0   ;;  %s5613_s0 = inlined_call_operand.vmem [shape: f32[2,1040,36], index: 0, kind: input, shape index: {}]   ;;  %s5614_s1 = inlined_call_operand.vmem [shape: f32[108,128], index: 1, kind: input, shape index: {}]   ;;  %s5615_s2 = inlined_call_operand.vmem [shape: f32[1,128], index: 2, kind: input, shape index: {}]   ;;  %s5616_s3 = inlined_call_operand.vmem [shape: f32[2,832,128], index: 3, kind: output, shape index: {}]  }
   0x1   :  { %s4218_s14 = smov 0  }
   0x2 LB: > { %s25_s15 = sadd.s32 1, %s4188_s13  ;;  %p3598_p0 = scmp.ge.s32.totalorder %s4192_s14, 1  ;;  %s4192_s14 = sphi %s4218_s14, %s13_s14   ;;  %s4188_s13 = sphi %s4216_s13, %s5662_s13   ;;  %s4184_s12 = sphi %s4214_s12, %s5661_s12  }
   0x3   : > { %p27_p1 = scmp.ge.s32.totalorder %s25_s15, 2  ;;  %p151_p2 = scmp.lt.s32.totalorder %s4192_s14, 3 }
   0x5   : > { %s5664_s15 = smov (%p27_p1, %s25_s15), 0  ;;  %p152_p3 = pnand %p3598_p0, %p151_p2 }
   0x7   : > { %155 = sbr.rel (%p152_p3) target bundleno = 777 (0x309), region = 32 }
   0xc   : > { %v304_v0 = vld [vmem:[%s5614_s1 + $0x20] sm:$0xf]  ;;  %vm618_vm0 = vcmask 1043456   ;;  %v2232_v1 = vld [vmem:[%s5614_s1 + $0x68] sm:$0xf]  ;;  %v303_v2 = vld [vmem:[%s5614_s1 + $0x18] sm:$0xff] }
   0xd   : > { %4126 = vmatpush.msk.msra.mxu3 %vm618_vm0, %v304_v0  ;;  %4019 = vmatpush.msk.msra.mxu2 %vm618_vm0, %v2232_v1  ;;  %v2231_v3 = vld [vmem:[%s5614_s1 + $0x60] sm:$0xff]  ;;  %p179_p4 = scmp.lt.s32.totalorder %s4184_s12, 1  ;;  %v302_v5 = vld [vmem:[%s5614_s1 + $0x10] sm:$0xff]  ;;  %v2230_v6 = vld [vmem:[%s5614_s1 + $0x58] sm:$0xff]  ;;  %vm305_vm1 = vcmask 293888  }
   0xe   : > { %v1165_v4 = vld [vmem:[%s5614_s1 + $0x44] sm:$0xf]  ;;  %3601 = vmatpush.msk.msra.mxu0 %vm618_vm0, %v304_v0  ;;  %v1164_v7 = vld [vmem:[%s5614_s1 + $0x3c] sm:$0xff]  ;;  %v1163_v8 = vld [vmem:[%s5614_s1 + $0x34] sm:$0xff] }
   0xf   : > { %3810 = vmatpush.msk.msra.mxu1 %vm618_vm0, %v1165_v4  ;;  %4127 = vmatpush.msra.mxu3 %v303_v2  ;;  %s5666_s12 = smov (!%p179_p4, %s4184_s12), 1  ;;  %v301_v9 = vld [vmem:[%s5614_s1 + $0x8] sm:$0xff]  ;;  %v2229_v10 = vld [vmem:[%s5614_s1 + $0x50] sm:$0xff]  ;;  %v300_v12 = vld [vmem:[%s5614_s1] sm:$0xff] }
  0x10   : > { %2560 = vmatpush.msra.mxu2 %v2231_v3  ;;  %634 = vmatpush.msra.mxu0 %v303_v2  ;;  %s4141_s11 = smul.u32 1040, %s5666_s12  ;;  %v1162_v11 = vld [vmem:[%s5614_s1 + $0x2c] sm:$0xff]  ;;  %v1161_v16 = vld [vmem:[%s5614_s1 + $0x24] sm:$0xff] }
  0x11   : > { %1493 = vmatpush.msra.mxu1 %v1164_v7  ;;  %4128 = vmatpush.msra.mxu3 %v302_v5  ;;  %v2228_v13 = vld [vmem:[%s5614_s1 + $0x48] sm:$0xff]  ;;  %s4142_s27 = smul.u32 832, %s5666_s12 }
  0x12   : > { %2561 = vmatpush.msra.mxu2 %v2230_v6  ;;  %635 = vmatpush.msra.mxu0 %v302_v5  ;;  %s4284_s24 = scalar_lea.vmem %s5613_s0, %s4141_s11 }
  0x13   : > { %1494 = vmatpush.msra.mxu1 %v1163_v8  ;;  %4129 = vmatpush.msra.mxu3 %v301_v9  ;;  %v274_v14 = vld [vmem:[%s4284_s24 + $0x270] sm:$0xff]  ;;  %v196_v17 = vld [vmem:[%s4284_s24] sm:$0xff]  ;;  %v4298_v18 = vld [vmem:[%s4284_s24 + $0x68] sm:$0xff]  ;;  %s4540_s12 = scalar_lea.vmem %s5616_s3, %s4142_s27 }
  0x14   : > { %2562 = vmatpush.msra.mxu2 %v2229_v10  ;;  %v4288_v15 = vld [vmem:[%s4284_s24 + $0xd0] sm:$0xff]  ;;  %636 = vmatpush.msra.mxu0 %v301_v9  ;;  %v275_v19 = vld [vmem:[%s4284_s24 + $0x278] sm:$0xff]  ;;  %v197_v21 = vld [vmem:[%s4284_s24 + $0x8] sm:$0xff] }
  0x15   : > { %1495 = vmatpush.msra.mxu1 %v1162_v11  ;;  %4130 = vmatpush.msra.mxu3 %v300_v12  ;;  %v4306_v20 = vld [vmem:[%s4284_s24 + $0xd8] sm:$0xff]  ;;  %v4313_v22 = vld [vmem:[%s4284_s24 + $0x70] sm:$0xff]  ;;  %v276_v23 = vld [vmem:[%s4284_s24 + $0x280] sm:$0xff] }
  0x16   : > { %2563 = vmatpush.msra.mxu2 %v2228_v13  ;;  %3680 = vmatmul.msk.f32.vlgmr.msra.gmra.mxu3 %vm305_vm1, %v274_v14  ;;  %v4321_v24 = vld [vmem:[%s4284_s24 + $0xe0] sm:$0xff]  ;;  %v198_v25 = vld [vmem:[%s4284_s24 + $0x10] sm:$0xff]  ;;  %v4328_v26 = vld [vmem:[%s4284_s24 + $0x78] sm:$0xff] }
  0x17   : > { %4020 = vmatmul.msk.f32.vlgmr.msra.gmra.mxu2 %vm305_vm1, %v4288_v15  ;;  %4131 = vmatpush.msk.msrb.mxu3 %vm618_vm0, %v1165_v4  ;;  %v277_v27 = vld [vmem:[%s4284_s24 + $0x288] sm:$0xff]  ;;  %v199_v29 = vld [vmem:[%s4284_s24 + $0x18] sm:$0xff]  ;;  %v4342_v30 = vld [vmem:[%s4284_s24 + $0x80] sm:$0xff] }
  0x18   : > { %637 = vmatpush.msra.mxu0 %v300_v12  ;;  %1496 = vmatpush.msra.mxu1 %v1161_v16  ;;  %v4335_v28 = vld [vmem:[%s4284_s24 + $0xe8] sm:$0xff]  ;;  %v278_v31 = vld [vmem:[%s4284_s24 + $0x290] sm:$0xff]  ;;  %v200_v33 = vld [vmem:[%s4284_s24 + $0x20] sm:$0xff] }
  0x19   : > { %3602 = vmatmul.msk.f32.vlgmr.msra.gmra.mxu0 %vm305_vm1, %v196_v17  ;;  %3811 = vmatmul.msk.f32.vlgmr.msra.gmra.mxu1 %vm305_vm1, %v4298_v18  ;;  %v4349_v32 = vld [vmem:[%s4284_s24 + $0xf0] sm:$0xff]  ;;  %v4356_v34 = vld [vmem:[%s4284_s24 + $0x88] sm:$0xff]  ;;  %v279_v35 = vld [vmem:[%s4284_s24 + $0x298] sm:$0xff] }
  0x1a   : > { %4132 = vmatpush.msrb.mxu3 %v1164_v7  ;;  %v4363_v36 = vld [vmem:[%s4284_s24 + $0xf8] sm:$0xff]  ;;  %v201_v37 = vld [vmem:[%s4284_s24 + $0x28] sm:$0xff]  ;;  %v4370_v38 = vld [vmem:[%s4284_s24 + $0x90] sm:$0xff] }
  0x1b   : > { %v280_v39 = vld [vmem:[%s4284_s24 + $0x2a0] sm:$0xff]  ;;  %v202_v41 = vld [vmem:[%s4284_s24 + $0x30] sm:$0xff]  ;;  %v4384_v42 = vld [vmem:[%s4284_s24 + $0x98] sm:$0xff] }
  0x1c   : > { %4133 = vmatpush.msrb.mxu3 %v1163_v8  ;;  %v4377_v40 = vld [vmem:[%s4284_s24 + $0x100] sm:$0xff]  ;;  %v281_v43 = vld [vmem:[%s4284_s24 + $0x2a8] sm:$0xff]  ;;  %v203_v45 = vld [vmem:[%s4284_s24 + $0x38] sm:$0xff] }
  0x1d   : > { %v4391_v44 = vld [vmem:[%s4284_s24 + $0x108] sm:$0xff]  ;;  %v4398_v46 = vld [vmem:[%s4284_s24 + $0xa0] sm:$0xff]  ;;  %v282_v47 = vld [vmem:[%s4284_s24 + $0x2b0] sm:$0xff] }
  0x1e   : > { %4134 = vmatpush.msrb.mxu3 %v1162_v11  ;;  %v4405_v48 = vld [vmem:[%s4284_s24 + $0x110] sm:$0xff]  ;;  %v204_v49 = vld [vmem:[%s4284_s24 + $0x40] sm:$0xff]  ;;  %v4412_v50 = vld [vmem:[%s4284_s24 + $0xa8] sm:$0xff] }
  0x1f   : > { %3681 = vmatmul.msk.f32.gmra.mxu3 %vm305_vm1, %v275_v19  ;;  %4021 = vmatmul.msk.f32.gmra.mxu2 %vm305_vm1, %v4306_v20  ;;  %v283_v51 = vld [vmem:[%s4284_s24 + $0x2b8] sm:$0xff]  ;;  %v205_v53 = vld [vmem:[%s4284_s24 + $0x48] sm:$0xff]  ;;  %v4426_v54 = vld [vmem:[%s4284_s24 + $0xb0] sm:$0xff] }
  0x20   : > { %4135 = vmatpush.msrb.mxu3 %v1161_v16  ;;  %v4419_v52 = vld [vmem:[%s4284_s24 + $0x118] sm:$0xff]  ;;  %v284_v55 = vld [vmem:[%s4284_s24 + $0x2c0] sm:$0xff]  ;;  %v206_v57 = vld [vmem:[%s4284_s24 + $0x50] sm:$0xff] }
  0x21   : > { %3603 = vmatmul.msk.f32.gmra.mxu0 %vm305_vm1, %v197_v21  ;;  %3812 = vmatmul.msk.f32.gmra.mxu1 %vm305_vm1, %v4313_v22  ;;  %v4433_v56 = vld [vmem:[%s4284_s24 + $0x120] sm:$0xff]  ;;  %v4440_v58 = vld [vmem:[%s4284_s24 + $0xb8] sm:$0xff]  ;;  %v285_v59 = vld [vmem:[%s4284_s24 + $0x2c8] sm:$0xff] }
  0x22   : > { %4136 = vmatpush.msk.msra.mxu3 %vm618_vm0, %v2232_v1  ;;  %v4447_v60 = vld [vmem:[%s4284_s24 + $0x128] sm:$0xff]  ;;  %v207_v61 = vld [vmem:[%s4284_s24 + $0x58] sm:$0xff]  ;;  %v4454_v62 = vld [vmem:[%s4284_s24 + $0xc0] sm:$0xff] }
  0x23   : > { %v286_v63 = vld [vmem:[%s4284_s24 + $0x2d0] sm:$0xff]  ;;  %v208_v1 = vld [vmem:[%s4284_s24 + $0x60] sm:$0xff]  ;;  %v4468_v2 = vld [vmem:[%s4284_s24 + $0xc8] sm:$0xff] }
  0x24   : > { %4137 = vmatpush.msra.mxu3 %v2231_v3  ;;  %v4461_v0 = vld [vmem:[%s4284_s24 + $0x130] sm:$0xff]  ;;  %v4474_v3 = vld [vmem:[%s4284_s24 + $0x2d8] sm:$0xff]  ;;  %v4488_v5 = vld [vmem:[%s4284_s24 + $0x2e0] sm:$0xff] }
  0x25   : > { %v4477_v4 = vld [vmem:[%s4284_s24 + $0x138] sm:$0xff]  ;;  %v4502_v7 = vld [vmem:[%s4284_s24 + $0x2e8] sm:$0xff]  ;;  %v4516_v9 = vld [vmem:[%s4284_s24 + $0x2f0] sm:$0xff] }
  0x26   : > { %4138 = vmatpush.msra.mxu3 %v2230_v6  ;;  %v4491_v6 = vld [vmem:[%s4284_s24 + $0x140] sm:$0xff]  ;;  %v4505_v8 = vld [vmem:[%s4284_s24 + $0x148] sm:$0xff]  ;;  %v4543_v19 = vld [vmem:[%s4284_s24 + $0x2f8] sm:$0xff] }
  0x27   : > { %3682 = vmatmul.msk.f32.gmra.mxu3 %vm305_vm1, %v276_v23  ;;  %4022 = vmatmul.msk.f32.gmra.mxu2 %vm305_vm1, %v4321_v24  ;;  %v4529_v14 = vld [vmem:[%s5615_s2] ss:$0 sm:$0xff]  ;;  %v4546_v21 = vld [vmem:[%s4284_s24 + $0x158] sm:$0xff] }
  0x28   : > { %4139 = vmatpush.msra.mxu3 %v2229_v10  ;;  %v4519_v10 = vld [vmem:[%s4284_s24 + $0x150] sm:$0xff] }
  0x29   : > { %3604 = vmatmul.msk.f32.gmra.mxu0 %vm305_vm1, %v198_v25  ;;  %3813 = vmatmul.msk.f32.gmra.mxu1 %vm305_vm1, %v4328_v26 }
  0x2a   : > { %4140 = vmatpush.msra.mxu3 %v2228_v13 }
  0x2f   : > { %3683 = vmatmul.msk.f32.gmra.mxu3 %vm305_vm1, %v277_v27  ;;  %4023 = vmatmul.msk.f32.gmra.mxu2 %vm305_vm1, %v4335_v28 }
  0x31   : > { %3605 = vmatmul.msk.f32.gmra.mxu0 %vm305_vm1, %v199_v29  ;;  %3814 = vmatmul.msk.f32.gmra.mxu1 %vm305_vm1, %v4342_v30 }
  0x37   : > { %3684 = vmatmul.msk.f32.gmra.mxu3 %vm305_vm1, %v278_v31  ;;  %4024 = vmatmul.msk.f32.gmra.mxu2 %vm305_vm1, %v4349_v32  ;;  %v4561_v31 = vld [vmem:[%s4284_s24 + $0x300] sm:$0xff] }
  0x39   : > { %3606 = vmatmul.msk.f32.gmra.mxu0 %vm305_vm1, %v200_v33  ;;  %3815 = vmatmul.msk.f32.gmra.mxu1 %vm305_vm1, %v4356_v34  ;;  %v4564_v33 = vld [vmem:[%s4284_s24 + $0x160] sm:$0xff] }
  0x3f   : > { %3685 = vmatmul.msk.f32.gmra.mxu3 %vm305_vm1, %v279_v35  ;;  %4025 = vmatmul.msk.f32.gmra.mxu2 %vm305_vm1, %v4363_v36 }
  0x41   : > { %3607 = vmatmul.msk.f32.gmra.mxu0 %vm305_vm1, %v201_v37  ;;  %3816 = vmatmul.msk.f32.gmra.mxu1 %vm305_vm1, %v4370_v38 }
  0x47   : > { %3686 = vmatmul.msk.f32.gmra.mxu3 %vm305_vm1, %v280_v39  ;;  %4026 = vmatmul.msk.f32.gmra.mxu2 %vm305_vm1, %v4377_v40 }
  0x49   : > { %3608 = vmatmul.msk.f32.gmra.mxu0 %vm305_vm1, %v202_v41  ;;  %3817 = vmatmul.msk.f32.gmra.mxu1 %vm305_vm1, %v4384_v42 }
  0x4f   : > { %3687 = vmatmul.msk.f32.gmra.mxu3 %vm305_vm1, %v281_v43  ;;  %4027 = vmatmul.msk.f32.gmra.mxu2 %vm305_vm1, %v4391_v44 }
  0x51   : > { %3609 = vmatmul.msk.f32.gmra.mxu0 %vm305_vm1, %v203_v45  ;;  %3818 = vmatmul.msk.f32.gmra.mxu1 %vm305_vm1, %v4398_v46 }
  0x57   : > { %3688 = vmatmul.msk.f32.gmra.mxu3 %vm305_vm1, %v282_v47  ;;  %4028 = vmatmul.msk.f32.gmra.mxu2 %vm305_vm1, %v4405_v48  ;;  %v4579_v47 = vld [vmem:[%s4284_s24 + $0x308] sm:$0xff] }
  0x59   : > { %3610 = vmatmul.msk.f32.gmra.mxu0 %vm305_vm1, %v204_v49  ;;  %3819 = vmatmul.msk.f32.gmra.mxu1 %vm305_vm1, %v4412_v50  ;;  %v4582_v49 = vld [vmem:[%s4284_s24 + $0x168] sm:$0xff] }
  0x5f   : > { %3689 = vmatmul.msk.f32.gmra.mxu3 %vm305_vm1, %v283_v51  ;;  %4029 = vmatmul.msk.f32.gmra.mxu2 %vm305_vm1, %v4419_v52 }
  0x61   : > { %3611 = vmatmul.msk.f32.gmra.mxu0 %vm305_vm1, %v205_v53  ;;  %3820 = vmatmul.msk.f32.gmra.mxu1 %vm305_vm1, %v4426_v54 }
  0x67   : > { %3690 = vmatmul.msk.f32.gmra.mxu3 %vm305_vm1, %v284_v55  ;;  %4030 = vmatmul.msk.f32.gmra.mxu2 %vm305_vm1, %v4433_v56 }
  0x69   : > { %3612 = vmatmul.msk.f32.gmra.mxu0 %vm305_vm1, %v206_v57  ;;  %3821 = vmatmul.msk.f32.gmra.mxu1 %vm305_vm1, %v4440_v58 }
  0x6f   : > { %3691 = vmatmul.msk.f32.gmra.mxu3 %vm305_vm1, %v285_v59  ;;  %4031 = vmatmul.msk.f32.gmra.mxu2 %vm305_vm1, %v4447_v60 }
  0x71   : > { %3613 = vmatmul.msk.f32.gmra.mxu0 %vm305_vm1, %v207_v61  ;;  %3822 = vmatmul.msk.f32.gmra.mxu1 %vm305_vm1, %v4454_v62 }
  0x77   : > { %3692 = vmatmul.msk.f32.gmra.mxu3 %vm305_vm1, %v286_v63  ;;  %4032 = vmatmul.msk.f32.gmra.mxu2 %vm305_vm1, %v4461_v0  ;;  %v4597_v63 = vld [vmem:[%s4284_s24 + $0x310] sm:$0xff] }
  0x79   : > { %3614 = vmatmul.msk.f32.gmra.mxu0 %vm305_vm1, %v208_v1  ;;  %3823 = vmatmul.msk.f32.gmra.mxu1 %vm305_vm1, %v4468_v2  ;;  %v4600_v1 = vld [vmem:[%s4284_s24 + $0x170] sm:$0xff] }
  0x7f   : > { %3693 = vmatmul.msk.f32.gmra.mxu3 %vm305_vm1, %v4474_v3  ;;  %4033 = vmatmul.msk.f32.gmra.mxu2 %vm305_vm1, %v4477_v4 }
  0x81   : > { %3615 = vmatmul.msk.f32.gmra.mxu0 %vm305_vm1, %v4298_v18  ;;  %3824 = vmatmul.msk.f32.gmra.mxu1 %vm305_vm1, %v4288_v15 }
  0x87   : > { %3694 = vmatmul.msk.f32.gmra.mxu3 %vm305_vm1, %v4488_v5  ;;  %4034 = vmatmul.msk.f32.gmra.mxu2 %vm305_vm1, %v4491_v6 }
  0x89   : > { %3616 = vmatmul.msk.f32.gmra.mxu0 %vm305_vm1, %v4313_v22  ;;  %3825 = vmatmul.msk.f32.gmra.mxu1 %vm305_vm1, %v4306_v20 }
  0x8f   : > { %3695 = vmatmul.msk.f32.gmra.mxu3 %vm305_vm1, %v4502_v7  ;;  %4035 = vmatmul.msk.f32.gmra.mxu2 %vm305_vm1, %v4505_v8 }
  0x91   : > { %3617 = vmatmul.msk.f32.gmra.mxu0 %vm305_vm1, %v4328_v26  ;;  %3826 = vmatmul.msk.f32.gmra.mxu1 %vm305_vm1, %v4321_v24 }
  0x96   : > { %v639_v11 = vpop.f32.mrf.mxu0  ;;  %v1498_v12 = vpop.f32.mrf.mxu1 }
  0x97   : > { %3696 = vmatmul.msk.f32.gmra.mxu3 %vm305_vm1, %v4516_v9  ;;  %4036 = vmatmul.msk.f32.gmra.mxu2 %vm305_vm1, %v4519_v10  ;;  %v1914_v13 = vadd.f32 %v1498_v12, %v639_v11 }
  0x99   : > { %3618 = vmatmul.msk.f32.gmra.mxu0 %vm305_vm1, %v4342_v30  ;;  %v4533_v16 = vpop.f32.mrf.mxu3  ;;  %3827 = vmatmul.msk.f32.gmra.mxu1 %vm305_vm1, %v4335_v28 }
  0x9a   : > { %v2565_v17 = vpop.f32.mrf.mxu2 }
  0x9b   : > { %v2981_v18 = vadd.f32 %v2565_v17, %v1914_v13 }
  0x9d   : > { %v3297_v22 = vadd.f32 %v4529_v14, %v2981_v18 }
  0x9e   : > { %v642_v23 = vpop.f32.mrf.mxu0  ;;  %v1501_v25 = vpop.f32.mrf.mxu1 }
  0x9f   : > { %3401 = vst [vmem:[%s4540_s12] sm:$0xff] %v3297_v22  ;;  %3697 = vmatmul.msk.f32.gmra.mxu3 %vm305_vm1, %v4543_v19  ;;  %4037 = vmatmul.msk.f32.gmra.mxu2 %vm305_vm1, %v4546_v21  ;;  %v1915_v26 = vadd.f32 %v1501_v25, %v642_v23  ;;  %v4615_v23 = vld [vmem:[%s4284_s24 + $0x318] sm:$0xff] }
  0xa0   : > { %v4618_v25 = vld [vmem:[%s4284_s24 + $0x178] sm:$0xff] }
  0xa1   : > { %3619 = vmatmul.msk.f32.gmra.mxu0 %vm305_vm1, %v4356_v34  ;;  %3828 = vmatmul.msk.f32.gmra.mxu1 %vm305_vm1, %v4349_v32 }
  0xa2   : > { %v4556_v27 = vpop.f32.mrf.mxu3  ;;  %v2568_v29 = vpop.f32.mrf.mxu2 }
  0xa3   : > { %v2982_v30 = vadd.f32 %v2568_v29, %v1915_v26 }
  0xa5   : > { %v3298_v35 = vadd.f32 %v4529_v14, %v2982_v30 }
  0xa6   : > { %v645_v37 = vpop.f32.mrf.mxu0  ;;  %v1504_v34 = vpop.f32.mrf.mxu1 }
  0xa7   : > { %3402 = vst [vmem:[%s4540_s12 + $0x8] sm:$0xff] %v3298_v35  ;;  %3698 = vmatmul.msk.f32.gmra.mxu3 %vm305_vm1, %v4561_v31  ;;  %4038 = vmatmul.msk.f32.gmra.mxu2 %vm305_vm1, %v4564_v33  ;;  %v1916_v39 = vadd.f32 %v1504_v34, %v645_v37 }
  0xa9   : > { %3620 = vmatmul.msk.f32.gmra.mxu0 %vm305_vm1, %v4370_v38  ;;  %3829 = vmatmul.msk.f32.gmra.mxu1 %vm305_vm1, %v4363_v36 }
  0xaa   : > { %v4574_v41 = vpop.f32.mrf.mxu3  ;;  %v2571_v43 = vpop.f32.mrf.mxu2 }
  0xab   : > { %v2983_v45 = vadd.f32 %v2571_v43, %v1916_v39  ;;  %v4633_v39 = vld [vmem:[%s4284_s24 + $0x320] sm:$0xff] }
  0xac   : > { %v4636_v43 = vld [vmem:[%s4284_s24 + $0x180] sm:$0xff] }
  0xad   : > { %v3299_v51 = vadd.f32 %v4529_v14, %v2983_v45 }
  0xae   : > { %v648_v53 = vpop.f32.mrf.mxu0  ;;  %v1507_v38 = vpop.f32.mrf.mxu1 }
  0xaf   : > { %3403 = vst [vmem:[%s4540_s12 + $0x10] sm:$0xff] %v3299_v51  ;;  %3699 = vmatmul.msk.f32.gmra.mxu3 %vm305_vm1, %v4579_v47  ;;  %4039 = vmatmul.msk.f32.gmra.mxu2 %vm305_vm1, %v4582_v49  ;;  %v1917_v55 = vadd.f32 %v1507_v38, %v648_v53 }
  0xb1   : > { %3621 = vmatmul.msk.f32.gmra.mxu0 %vm305_vm1, %v4384_v42  ;;  %3830 = vmatmul.msk.f32.gmra.mxu1 %vm305_vm1, %v4377_v40 }
  0xb2   : > { %v4592_v57 = vpop.f32.mrf.mxu3  ;;  %v2574_v59 = vpop.f32.mrf.mxu2 }
  0xb3   : > { %v2984_v61 = vadd.f32 %v2574_v59, %v1917_v55 }
  0xb5   : > { %v3300_v11 = vadd.f32 %v4529_v14, %v2984_v61  ;;  %v4651_v61 = vld [vmem:[%s4284_s24 + $0x328] sm:$0xff] }
  0xb6   : > { %v651_v12 = vpop.f32.mrf.mxu0  ;;  %v1510_v42 = vpop.f32.mrf.mxu1 }
  0xb7   : > { %3404 = vst [vmem:[%s4540_s12 + $0x18] sm:$0xff] %v3300_v11  ;;  %3700 = vmatmul.msk.f32.gmra.mxu3 %vm305_vm1, %v4597_v63  ;;  %4040 = vmatmul.msk.f32.gmra.mxu2 %vm305_vm1, %v4600_v1  ;;  %v1918_v13 = vadd.f32 %v1510_v42, %v651_v12  ;;  %v4654_v11 = vld [vmem:[%s4284_s24 + $0x188] sm:$0xff] }
  0xb9   : > { %3622 = vmatmul.msk.f32.gmra.mxu0 %vm305_vm1, %v4398_v46  ;;  %3831 = vmatmul.msk.f32.gmra.mxu1 %vm305_vm1, %v4391_v44 }
  0xba   : > { %v4610_v17 = vpop.f32.mrf.mxu3  ;;  %v2577_v18 = vpop.f32.mrf.mxu2 }
  0xbb   : > { %v2985_v22 = vadd.f32 %v2577_v18, %v1918_v13 }
  0xbd   : > { %v3301_v26 = vadd.f32 %v4529_v14, %v2985_v22 }
  0xbe   : > { %v654_v29 = vpop.f32.mrf.mxu0  ;;  %v1513_v46 = vpop.f32.mrf.mxu1 }
  0xbf   : > { %3405 = vst [vmem:[%s4540_s12 + $0x20] sm:$0xff] %v3301_v26  ;;  %3701 = vmatmul.msk.f32.gmra.mxu3 %vm305_vm1, %v4615_v23  ;;  %4041 = vmatmul.msk.f32.gmra.mxu2 %vm305_vm1, %v4618_v25  ;;  %v1919_v30 = vadd.f32 %v1513_v46, %v654_v29  ;;  %v4669_v29 = vld [vmem:[%s4284_s24 + $0x330] sm:$0xff] }
  0xc0   : > { %v4672_v46 = vld [vmem:[%s4284_s24 + $0x190] sm:$0xff] }
  0xc1   : > { %3623 = vmatmul.msk.f32.gmra.mxu0 %vm305_vm1, %v4412_v50  ;;  %3832 = vmatmul.msk.f32.gmra.mxu1 %vm305_vm1, %v4405_v48 }
  0xc2   : > { %v4628_v35 = vpop.f32.mrf.mxu3  ;;  %v2580_v37 = vpop.f32.mrf.mxu2 }
  0xc3   : > { %v2986_v34 = vadd.f32 %v2580_v37, %v1919_v30 }
  0xc5   : > { %v3302_v45 = vadd.f32 %v4529_v14, %v2986_v34 }
  0xc6   : > { %v657_v51 = vpop.f32.mrf.mxu0  ;;  %v1516_v50 = vpop.f32.mrf.mxu1 }
  0xc7   : > { %3406 = vst [vmem:[%s4540_s12 + $0x28] sm:$0xff] %v3302_v45  ;;  %3702 = vmatmul.msk.f32.gmra.mxu3 %vm305_vm1, %v4633_v39  ;;  %4042 = vmatmul.msk.f32.gmra.mxu2 %vm305_vm1, %v4636_v43  ;;  %v1920_v53 = vadd.f32 %v1516_v50, %v657_v51 }
  0xc9   : > { %3624 = vmatmul.msk.f32.gmra.mxu0 %vm305_vm1, %v4426_v54  ;;  %3833 = vmatmul.msk.f32.gmra.mxu1 %vm305_vm1, %v4419_v52 }
  0xca   : > { %v4646_v38 = vpop.f32.mrf.mxu3  ;;  %v2583_v55 = vpop.f32.mrf.mxu2 }
  0xcb   : > { %v2987_v59 = vadd.f32 %v2583_v55, %v1920_v53  ;;  %v4687_v53 = vld [vmem:[%s4284_s24 + $0x338] sm:$0xff] }
  0xcc   : > { %v4690_v55 = vld [vmem:[%s4284_s24 + $0x198] sm:$0xff] }
  0xcd   : > { %v3303_v12 = vadd.f32 %v4529_v14, %v2987_v59 }
  0xce   : > { %v660_v42 = vpop.f32.mrf.mxu0  ;;  %v1519_v54 = vpop.f32.mrf.mxu1 }
  0xcf   : > { %3407 = vst [vmem:[%s4540_s12 + $0x30] sm:$0xff] %v3303_v12  ;;  %3703 = vmatmul.msk.f32.gmra.mxu3 %vm305_vm1, %v4651_v61  ;;  %4043 = vmatmul.msk.f32.gmra.mxu2 %vm305_vm1, %v4654_v11  ;;  %v1921_v13 = vadd.f32 %v1519_v54, %v660_v42 }
  0xd1   : > { %3625 = vmatmul.msk.f32.gmra.mxu0 %vm305_vm1, %v4440_v58  ;;  %3834 = vmatmul.msk.f32.gmra.mxu1 %vm305_vm1, %v4433_v56 }
  0xd2   : > { %v4664_v18 = vpop.f32.mrf.mxu3  ;;  %v2586_v22 = vpop.f32.mrf.mxu2 }
  0xd3   : > { %5617 = vst [vmem:[#allocation3_spill] sm:$0xff] %v4664_v18  ;;  %v2988_v26 = vadd.f32 %v2586_v22, %v1921_v13 }
  0xd5   : > { %v3304_v30 = vadd.f32 %v4529_v14, %v2988_v26  ;;  %v4705_v26 = vld [vmem:[%s4284_s24 + $0x1a0] sm:$0xff] }
  0xd6   : > { %v663_v37 = vpop.f32.mrf.mxu0  ;;  %v1522_v58 = vpop.f32.mrf.mxu1 }
  0xd7   : > { %3408 = vst [vmem:[%s4540_s12 + $0x38] sm:$0xff] %v3304_v30  ;;  %3704 = vmatmul.msk.f32.gmra.mxu3 %vm305_vm1, %v4669_v29  ;;  %4044 = vmatmul.msk.f32.gmra.mxu2 %vm305_vm1, %v4672_v46  ;;  %v1922_v34 = vadd.f32 %v1522_v58, %v663_v37 }
  0xd9   : > { %3626 = vmatmul.msk.f32.gmra.mxu0 %vm305_vm1, %v4454_v62  ;;  %3835 = vmatmul.msk.f32.gmra.mxu1 %vm305_vm1, %v4447_v60 }
  0xda   : > { %v4682_v45 = vpop.f32.mrf.mxu3  ;;  %v2589_v51 = vpop.f32.mrf.mxu2 }
  0xdb   : > { %5618 = vst [vmem:[#allocation4_spill] sm:$0xff] %v4682_v45  ;;  %v2989_v50 = vadd.f32 %v2589_v51, %v1922_v34  ;;  %v5119_v45 = vld [vmem:[%s4284_s24 + $0x268] sm:$0xff] }
  0xdd   : > { %v3305_v59 = vadd.f32 %v4529_v14, %v2989_v50 }
  0xde   : > { %v666_v12 = vpop.f32.mrf.mxu0  ;;  %v1525_v62 = vpop.f32.mrf.mxu1 }
  0xdf   : > { %3409 = vst [vmem:[%s4540_s12 + $0x40] sm:$0xff] %v3305_v59  ;;  %3705 = vmatmul.msk.f32.gmra.mxu3 %vm305_vm1, %v4687_v53  ;;  %4045 = vmatmul.msk.f32.gmra.mxu2 %vm305_vm1, %v4690_v55  ;;  %v1923_v42 = vadd.f32 %v1525_v62, %v666_v12  ;;  %v4720_v59 = vld [vmem:[%s4284_s24 + $0x1a8] sm:$0xff] }
  0xe1   : > { %3627 = vmatmul.msk.f32.gmra.mxu0 %vm305_vm1, %v4468_v2  ;;  %3836 = vmatmul.msk.f32.gmra.mxu1 %vm305_vm1, %v4461_v0 }
  0xe2   : > { %v4700_v54 = vpop.f32.mrf.mxu3  ;;  %v2592_v13 = vpop.f32.mrf.mxu2 }
  0xe3   : > { %5619 = vst [vmem:[#allocation5_spill] sm:$0xff] %v4700_v54  ;;  %v2990_v22 = vadd.f32 %v2592_v13, %v1923_v42 }
  0xe5   : > { %v3306_v30 = vadd.f32 %v4529_v14, %v2990_v22 }
  0xe6   : > { %v669_v37 = vpop.f32.mrf.mxu0  ;;  %v1528_v2 = vpop.f32.mrf.mxu1 }
  0xe7   : > { %3410 = vst [vmem:[%s4540_s12 + $0x48] sm:$0xff] %v3306_v30  ;;  %3889 = vmatmul.msk.f32.vlgmr.msrb.gmra.mxu3 %vm305_vm1, %v4474_v3  ;;  %4046 = vmatmul.msk.f32.gmra.mxu2 %vm305_vm1, %v4705_v26  ;;  %v1924_v58 = vadd.f32 %v1528_v2, %v669_v37  ;;  %v4735_v30 = vld [vmem:[%s4284_s24 + $0x1b0] sm:$0xff] }
  0xe9   : > { %3628 = vmatmul.msk.f32.gmra.mxu0 %vm305_vm1, %v4288_v15  ;;  %3837 = vmatmul.msk.f32.gmra.mxu1 %vm305_vm1, %v4477_v4 }
  0xea   : > { %v4715_v34 = vpop.f32.mrf.mxu3  ;;  %v2595_v51 = vpop.f32.mrf.mxu2 }
  0xeb   : > { %5620 = vst [vmem:[#allocation6_spill] sm:$0xff] %v4715_v34  ;;  %v2991_v50 = vadd.f32 %v2595_v51, %v1924_v58  ;;  %v5101_v34 = vld [vmem:[%s4284_s24 + $0x260] sm:$0xff] }
  0xed   : > { %v3307_v3 = vadd.f32 %v4529_v14, %v2991_v50 }
  0xee   : > { %v672_v12 = vpop.f32.mrf.mxu0  ;;  %v1531_v15 = vpop.f32.mrf.mxu1 }
  0xef   : > { %3411 = vst [vmem:[%s4540_s12 + $0x50] sm:$0xff] %v3307_v3  ;;  %3890 = vmatmul.msk.f32.gmra.mxu3 %vm305_vm1, %v4488_v5  ;;  %4047 = vmatmul.msk.f32.gmra.mxu2 %vm305_vm1, %v4720_v59  ;;  %v1925_v62 = vadd.f32 %v1531_v15, %v672_v12  ;;  %v4750_v3 = vld [vmem:[%s4284_s24 + $0x1b8] sm:$0xff] }
  0xf1   : > { %3629 = vmatmul.msk.f32.gmra.mxu0 %vm305_vm1, %v4306_v20  ;;  %3838 = vmatmul.msk.f32.gmra.mxu1 %vm305_vm1, %v4491_v6 }
  0xf2   : > { %v4730_v42 = vpop.f32.mrf.mxu3  ;;  %v2598_v13 = vpop.f32.mrf.mxu2 }
  0xf3   : > { %5621 = vst [vmem:[#allocation7_spill] sm:$0xff] %v4730_v42  ;;  %v2992_v22 = vadd.f32 %v2598_v13, %v1925_v62 }
  0xf5   : > { %v3308_v5 = vadd.f32 %v4529_v14, %v2992_v22 }
  0xf6   : > { %v675_v37 = vpop.f32.mrf.mxu0  ;;  %v1534_v20 = vpop.f32.mrf.mxu1 }
  0xf7   : > { %3412 = vst [vmem:[%s4540_s12 + $0x58] sm:$0xff] %v3308_v5  ;;  %3891 = vmatmul.msk.f32.gmra.mxu3 %vm305_vm1, %v4502_v7  ;;  %4048 = vmatmul.msk.f32.gmra.mxu2 %vm305_vm1, %v4735_v30  ;;  %v1926_v2 = vadd.f32 %v1534_v20, %v675_v37  ;;  %v4765_v5 = vld [vmem:[%s4284_s24 + $0x1c0] sm:$0xff] }
  0xf9   : > { %3630 = vmatmul.msk.f32.gmra.mxu0 %vm305_vm1, %v4321_v24  ;;  %3839 = vmatmul.msk.f32.gmra.mxu1 %vm305_vm1, %v4505_v8 }
  0xfa   : > { %v4745_v58 = vpop.f32.mrf.mxu3  ;;  %v2601_v51 = vpop.f32.mrf.mxu2 }
  0xfb   : > { %5622 = vst [vmem:[#allocation8_spill] sm:$0xff] %v4745_v58  ;;  %v2993_v50 = vadd.f32 %v2601_v51, %v1926_v2  ;;  %v5083_v58 = vld [vmem:[%s4284_s24 + $0x258] sm:$0xff] }
  0xfd   : > { %v3309_v7 = vadd.f32 %v4529_v14, %v2993_v50 }
  0xfe   : > { %v678_v12 = vpop.f32.mrf.mxu0  ;;  %v1537_v24 = vpop.f32.mrf.mxu1 }
  0xff   : > { %3413 = vst [vmem:[%s4540_s12 + $0x60] sm:$0xff] %v3309_v7  ;;  %3892 = vmatmul.msk.f32.gmra.mxu3 %vm305_vm1, %v4516_v9  ;;  %4049 = vmatmul.msk.f32.gmra.mxu2 %vm305_vm1, %v4750_v3  ;;  %v1927_v15 = vadd.f32 %v1537_v24, %v678_v12  ;;  %v4780_v7 = vld [vmem:[%s4284_s24 + $0x1c8] sm:$0xff] }
 0x101   : > { %3631 = vmatmul.msk.f32.gmra.mxu0 %vm305_vm1, %v4335_v28  ;;  %3840 = vmatmul.msk.f32.gmra.mxu1 %vm305_vm1, %v4519_v10 }
 0x102   : > { %v4760_v62 = vpop.f32.mrf.mxu3  ;;  %v2604_v13 = vpop.f32.mrf.mxu2 }
 0x103   : > { %5623 = vst [vmem:[#allocation9_spill] sm:$0xff] %v4760_v62  ;;  %v2994_v22 = vadd.f32 %v2604_v13, %v1927_v15 }
 0x105   : > { %v3310_v9 = vadd.f32 %v4529_v14, %v2994_v22 }
 0x106   : > { %v681_v37 = vpop.f32.mrf.mxu0  ;;  %v1540_v28 = vpop.f32.mrf.mxu1 }
 0x107   : > { %3414 = vst [vmem:[%s4540_s12 + $0x68] sm:$0xff] %v3310_v9  ;;  %3893 = vmatmul.msk.f32.gmra.mxu3 %vm305_vm1, %v4543_v19  ;;  %4050 = vmatmul.msk.f32.gmra.mxu2 %vm305_vm1, %v4765_v5  ;;  %v1928_v20 = vadd.f32 %v1540_v28, %v681_v37  ;;  %v4795_v9 = vld [vmem:[%s4284_s24 + $0x1d0] sm:$0xff] }
 0x109   : > { %3632 = vmatmul.msk.f32.gmra.mxu0 %vm305_vm1, %v4349_v32  ;;  %3841 = vmatmul.msk.f32.gmra.mxu1 %vm305_vm1, %v4546_v21 }
 0x10a   : > { %v4775_v2 = vpop.f32.mrf.mxu3  ;;  %v2607_v51 = vpop.f32.mrf.mxu2 }
 0x10b   : > { %5624 = vst [vmem:[#allocation10_spill] sm:$0xff] %v4775_v2  ;;  %v2995_v50 = vadd.f32 %v2607_v51, %v1928_v20  ;;  %v5065_v2 = vld [vmem:[%s4284_s24 + $0x250] sm:$0xff] }
 0x10d   : > { %v3311_v19 = vadd.f32 %v4529_v14, %v2995_v50 }
 0x10e   : > { %v684_v12 = vpop.f32.mrf.mxu0  ;;  %v1543_v32 = vpop.f32.mrf.mxu1 }
 0x10f   : > { %3415 = vst [vmem:[%s4540_s12 + $0x70] sm:$0xff] %v3311_v19  ;;  %3894 = vmatmul.msk.f32.gmra.mxu3 %vm305_vm1, %v4561_v31  ;;  %4051 = vmatmul.msk.f32.gmra.mxu2 %vm305_vm1, %v4780_v7  ;;  %v1929_v24 = vadd.f32 %v1543_v32, %v684_v12  ;;  %v4810_v19 = vld [vmem:[%s4284_s24 + $0x1d8] sm:$0xff] }
 0x111   : > { %3633 = vmatmul.msk.f32.gmra.mxu0 %vm305_vm1, %v4363_v36  ;;  %3842 = vmatmul.msk.f32.gmra.mxu1 %vm305_vm1, %v4564_v33 }
 0x112   : > { %v4790_v15 = vpop.f32.mrf.mxu3  ;;  %v2610_v13 = vpop.f32.mrf.mxu2 }
 0x113   : > { %5625 = vst [vmem:[#allocation11_spill] sm:$0xff] %v4790_v15  ;;  %v2996_v22 = vadd.f32 %v2610_v13, %v1929_v24 }
 0x115   : > { %v3312_v31 = vadd.f32 %v4529_v14, %v2996_v22 }
 0x116   : > { %v687_v37 = vpop.f32.mrf.mxu0  ;;  %v1546_v36 = vpop.f32.mrf.mxu1 }
 0x117   : > { %3416 = vst [vmem:[%s4540_s12 + $0x78] sm:$0xff] %v3312_v31  ;;  %3895 = vmatmul.msk.f32.gmra.mxu3 %vm305_vm1, %v4579_v47  ;;  %4052 = vmatmul.msk.f32.gmra.mxu2 %vm305_vm1, %v4795_v9  ;;  %v1930_v28 = vadd.f32 %v1546_v36, %v687_v37  ;;  %v4825_v31 = vld [vmem:[%s4284_s24 + $0x1e0] sm:$0xff] }
 0x119   : > { %3634 = vmatmul.msk.f32.gmra.mxu0 %vm305_vm1, %v4377_v40  ;;  %3843 = vmatmul.msk.f32.gmra.mxu1 %vm305_vm1, %v4582_v49 }
 0x11a   : > { %v4805_v20 = vpop.f32.mrf.mxu3  ;;  %v2613_v51 = vpop.f32.mrf.mxu2 }
 0x11b   : > { %5626 = vst [vmem:[#allocation12_spill] sm:$0xff] %v4805_v20  ;;  %v2997_v50 = vadd.f32 %v2613_v51, %v1930_v28  ;;  %v5047_v20 = vld [vmem:[%s4284_s24 + $0x248] sm:$0xff] }
 0x11d   : > { %v3313_v47 = vadd.f32 %v4529_v14, %v2997_v50 }
 0x11e   : > { %v690_v12 = vpop.f32.mrf.mxu0  ;;  %v1549_v40 = vpop.f32.mrf.mxu1 }
 0x11f   : > { %3417 = vst [vmem:[%s4540_s12 + $0x80] sm:$0xff] %v3313_v47  ;;  %3896 = vmatmul.msk.f32.gmra.mxu3 %vm305_vm1, %v4597_v63  ;;  %4053 = vmatmul.msk.f32.gmra.mxu2 %vm305_vm1, %v4810_v19  ;;  %v1931_v32 = vadd.f32 %v1549_v40, %v690_v12  ;;  %v4840_v47 = vld [vmem:[%s4284_s24 + $0x1e8] sm:$0xff] }
 0x121   : > { %3635 = vmatmul.msk.f32.gmra.mxu0 %vm305_vm1, %v4391_v44  ;;  %3844 = vmatmul.msk.f32.gmra.mxu1 %vm305_vm1, %v4600_v1 }
 0x122   : > { %v4820_v24 = vpop.f32.mrf.mxu3  ;;  %v2616_v13 = vpop.f32.mrf.mxu2 }
 0x123   : > { %5627 = vst [vmem:[#allocation13_spill] sm:$0xff] %v4820_v24  ;;  %v2998_v22 = vadd.f32 %v2616_v13, %v1931_v32 }
 0x125   : > { %v3314_v63 = vadd.f32 %v4529_v14, %v2998_v22 }
 0x126   : > { %v693_v37 = vpop.f32.mrf.mxu0  ;;  %v1552_v44 = vpop.f32.mrf.mxu1 }
 0x127   : > { %3418 = vst [vmem:[%s4540_s12 + $0x88] sm:$0xff] %v3314_v63  ;;  %3897 = vmatmul.msk.f32.gmra.mxu3 %vm305_vm1, %v4615_v23  ;;  %4054 = vmatmul.msk.f32.gmra.mxu2 %vm305_vm1, %v4825_v31  ;;  %v1932_v36 = vadd.f32 %v1552_v44, %v693_v37  ;;  %v4855_v63 = vld [vmem:[%s4284_s24 + $0x1f0] sm:$0xff] }
 0x129   : > { %3636 = vmatmul.msk.f32.gmra.mxu0 %vm305_vm1, %v4405_v48  ;;  %3845 = vmatmul.msk.f32.gmra.mxu1 %vm305_vm1, %v4618_v25 }
 0x12a   : > { %v4835_v28 = vpop.f32.mrf.mxu3  ;;  %v2619_v51 = vpop.f32.mrf.mxu2 }
 0x12b   : > { %5628 = vst [vmem:[#allocation14_spill] sm:$0xff] %v4835_v28  ;;  %v2999_v50 = vadd.f32 %v2619_v51, %v1932_v36  ;;  %v5029_v28 = vld [vmem:[%s4284_s24 + $0x240] sm:$0xff] }
 0x12d   : > { %v3315_v23 = vadd.f32 %v4529_v14, %v2999_v50 }
 0x12e   : > { %v696_v12 = vpop.f32.mrf.mxu0  ;;  %v1555_v48 = vpop.f32.mrf.mxu1 }
 0x12f   : > { %3419 = vst [vmem:[%s4540_s12 + $0x90] sm:$0xff] %v3315_v23  ;;  %3898 = vmatmul.msk.f32.gmra.mxu3 %vm305_vm1, %v4633_v39  ;;  %4055 = vmatmul.msk.f32.gmra.mxu2 %vm305_vm1, %v4840_v47  ;;  %v1933_v40 = vadd.f32 %v1555_v48, %v696_v12  ;;  %v4870_v23 = vld [vmem:[%s4284_s24 + $0x1f8] sm:$0xff] }
 0x131   : > { %3637 = vmatmul.msk.f32.gmra.mxu0 %vm305_vm1, %v4419_v52  ;;  %3846 = vmatmul.msk.f32.gmra.mxu1 %vm305_vm1, %v4636_v43 }
 0x132   : > { %v4850_v32 = vpop.f32.mrf.mxu3  ;;  %v2622_v13 = vpop.f32.mrf.mxu2 }
 0x133   : > { %5629 = vst [vmem:[#allocation15_spill] sm:$0xff] %v4850_v32  ;;  %v3000_v22 = vadd.f32 %v2622_v13, %v1933_v40 }
 0x135   : > { %v3316_v39 = vadd.f32 %v4529_v14, %v3000_v22 }
 0x136   : > { %v699_v37 = vpop.f32.mrf.mxu0  ;;  %v1558_v52 = vpop.f32.mrf.mxu1 }
 0x137   : > { %3420 = vst [vmem:[%s4540_s12 + $0x98] sm:$0xff] %v3316_v39  ;;  %3899 = vmatmul.msk.f32.gmra.mxu3 %vm305_vm1, %v4651_v61  ;;  %4056 = vmatmul.msk.f32.gmra.mxu2 %vm305_vm1, %v4855_v63  ;;  %v1934_v44 = vadd.f32 %v1558_v52, %v699_v37  ;;  %v4885_v39 = vld [vmem:[%s4284_s24 + $0x200] sm:$0xff] }
 0x139   : > { %3638 = vmatmul.msk.f32.gmra.mxu0 %vm305_vm1, %v4433_v56  ;;  %3847 = vmatmul.msk.f32.gmra.mxu1 %vm305_vm1, %v4654_v11 }
 0x13a   : > { %v4865_v36 = vpop.f32.mrf.mxu3  ;;  %v2625_v51 = vpop.f32.mrf.mxu2 }
 0x13b   : > { %5630 = vst [vmem:[#allocation16_spill] sm:$0xff] %v4865_v36  ;;  %v3001_v50 = vadd.f32 %v2625_v51, %v1934_v44  ;;  %v5011_v36 = vld [vmem:[%s4284_s24 + $0x238] sm:$0xff] }
 0x13d   : > { %v3317_v61 = vadd.f32 %v4529_v14, %v3001_v50 }
 0x13e   : > { %v702_v12 = vpop.f32.mrf.mxu0  ;;  %v1561_v56 = vpop.f32.mrf.mxu1 }
 0x13f   : > { %3421 = vst [vmem:[%s4540_s12 + $0xa0] sm:$0xff] %v3317_v61  ;;  %3900 = vmatmul.msk.f32.gmra.mxu3 %vm305_vm1, %v4669_v29  ;;  %4057 = vmatmul.msk.f32.gmra.mxu2 %vm305_vm1, %v4870_v23  ;;  %v1935_v48 = vadd.f32 %v1561_v56, %v702_v12  ;;  %v4900_v61 = vld [vmem:[%s4284_s24 + $0x340] sm:$0xff] }
 0x141   : > { %3639 = vmatmul.msk.f32.gmra.mxu0 %vm305_vm1, %v4447_v60  ;;  %3848 = vmatmul.msk.f32.gmra.mxu1 %vm305_vm1, %v4672_v46 }
 0x142   : > { %v4880_v40 = vpop.f32.mrf.mxu3  ;;  %v2628_v13 = vpop.f32.mrf.mxu2 }
 0x143   : > { %5631 = vst [vmem:[#allocation17_spill] sm:$0xff] %v4880_v40  ;;  %v3002_v22 = vadd.f32 %v2628_v13, %v1935_v48 }
 0x145   : > { %v3318_v29 = vadd.f32 %v4529_v14, %v3002_v22 }
 0x146   : > { %v705_v37 = vpop.f32.mrf.mxu0  ;;  %v1564_v60 = vpop.f32.mrf.mxu1 }
 0x147   : > { %3422 = vst [vmem:[%s4540_s12 + $0xa8] sm:$0xff] %v3318_v29  ;;  %3901 = vmatmul.msk.f32.gmra.mxu3 %vm305_vm1, %v4687_v53  ;;  %4058 = vmatmul.msk.f32.gmra.mxu2 %vm305_vm1, %v4885_v39  ;;  %v1936_v52 = vadd.f32 %v1564_v60, %v705_v37  ;;  %v4903_v53 = vld [vmem:[%s4284_s24 + $0x208] sm:$0xff]  ;;  %v4921_v60 = vld [vmem:[%s4284_s24 + $0x210] sm:$0xff] }
 0x148   : > { %v4918_v37 = vld [vmem:[%s4284_s24 + $0x348] sm:$0xff] }
 0x149   : > { %3640 = vmatmul.msk.f32.gmra.mxu0 %vm305_vm1, %v4461_v0  ;;  %3849 = vmatmul.msk.f32.gmra.mxu1 %vm305_vm1, %v4690_v55 }
 0x14a   : > { %v4895_v44 = vpop.f32.mrf.mxu3  ;;  %v2631_v51 = vpop.f32.mrf.mxu2 }
 0x14b   : > { %5632 = vst [vmem:[#allocation18_spill] sm:$0xff] %v4895_v44  ;;  %v3003_v50 = vadd.f32 %v2631_v51, %v1936_v52  ;;  %v4993_v44 = vld [vmem:[%s4284_s24 + $0x230] sm:$0xff] }
 0x14d   : > { %v3319_v12 = vadd.f32 %v4529_v14, %v3003_v50 }
 0x14e   : > { %v708_v56 = vpop.f32.mrf.mxu0  ;;  %v1567_v0 = vpop.f32.mrf.mxu1 }
 0x14f   : > { %3423 = vst [vmem:[%s4540_s12 + $0xb0] sm:$0xff] %v3319_v12  ;;  %3902 = vmatmul.msk.f32.gmra.mxu3 %vm305_vm1, %v4900_v61  ;;  %4059 = vmatmul.msk.f32.gmra.mxu2 %vm305_vm1, %v4903_v53  ;;  %v1937_v48 = vadd.f32 %v1567_v0, %v708_v56 }
 0x151   : > { %3641 = vmatmul.msk.f32.gmra.mxu0 %vm305_vm1, %v4477_v4  ;;  %3850 = vmatmul.msk.f32.gmra.mxu1 %vm305_vm1, %v4705_v26 }
 0x152   : > { %v4913_v13 = vpop.f32.mrf.mxu3  ;;  %v2634_v22 = vpop.f32.mrf.mxu2 }
 0x153   : > { %5633 = vst [vmem:[#allocation19_spill] sm:$0xff] %v4913_v13  ;;  %v3004_v29 = vadd.f32 %v2634_v22, %v1937_v48  ;;  %v4936_v48 = vld [vmem:[%s4284_s24 + $0x350] sm:$0xff]  ;;  %v4939_v22 = vld [vmem:[%s4284_s24 + $0x218] sm:$0xff] }
 0x155   : > { %v3320_v52 = vadd.f32 %v4529_v14, %v3004_v29 }
 0x156   : > { %v711_v51 = vpop.f32.mrf.mxu0  ;;  %v1570_v4 = vpop.f32.mrf.mxu1 }
 0x157   : > { %3424 = vst [vmem:[%s4540_s12 + $0xb8] sm:$0xff] %v3320_v52  ;;  %3903 = vmatmul.msk.f32.gmra.mxu3 %vm305_vm1, %v4918_v37  ;;  %4060 = vmatmul.msk.f32.gmra.mxu2 %vm305_vm1, %v4921_v60  ;;  %v1938_v50 = vadd.f32 %v1570_v4, %v711_v51 }
 0x159   : > { %3642 = vmatmul.msk.f32.gmra.mxu0 %vm305_vm1, %v4491_v6  ;;  %3851 = vmatmul.msk.f32.gmra.mxu1 %vm305_vm1, %v4720_v59 }
 0x15a   : > { %v4931_v12 = vpop.f32.mrf.mxu3  ;;  %v2637_v56 = vpop.f32.mrf.mxu2 }
 0x15b   : > { %5634 = vst [vmem:[#allocation20_spill] sm:$0xff] %v4931_v12  ;;  %v3005_v0 = vadd.f32 %v2637_v56, %v1938_v50 }
 0x15d   : > { %v3321_v29 = vadd.f32 %v4529_v14, %v3005_v0  ;;  %v4954_v0 = vld [vmem:[%s4284_s24 + $0x358] sm:$0xff] }
 0x15e   : > { %v714_v52 = vpop.f32.mrf.mxu0  ;;  %v1573_v6 = vpop.f32.mrf.mxu1 }
 0x15f   : > { %3425 = vst [vmem:[%s4540_s12 + $0xc0] sm:$0xff] %v3321_v29  ;;  %3904 = vmatmul.msk.f32.gmra.mxu3 %vm305_vm1, %v4936_v48  ;;  %4061 = vmatmul.msk.f32.gmra.mxu2 %vm305_vm1, %v4939_v22  ;;  %v1939_v51 = vadd.f32 %v1573_v6, %v714_v52  ;;  %v4957_v29 = vld [vmem:[%s4284_s24 + $0x220] sm:$0xff] }
 0x161   : > { %3643 = vmatmul.msk.f32.gmra.mxu0 %vm305_vm1, %v4505_v8  ;;  %3852 = vmatmul.msk.f32.gmra.mxu1 %vm305_vm1, %v4735_v30 }
 0x162   : > { %v4949_v4 = vpop.f32.mrf.mxu3  ;;  %v2640_v50 = vpop.f32.mrf.mxu2 }
 0x163   : > { %5635 = vst [vmem:[#allocation21_spill] sm:$0xff] %v4949_v4  ;;  %v3006_v56 = vadd.f32 %v2640_v50, %v1939_v51  ;;  %v4975_v4 = vld [vmem:[%s4284_s24 + $0x228] sm:$0xff] }
 0x165   : > { %v3322_v12 = vadd.f32 %v4529_v14, %v3006_v56 }
 0x166   : > { %v717_v52 = vpop.f32.mrf.mxu0  ;;  %v1576_v8 = vpop.f32.mrf.mxu1 }
 0x167   : > { %3426 = vst [vmem:[%s4540_s12 + $0xc8] sm:$0xff] %v3322_v12  ;;  %3905 = vmatmul.msk.f32.gmra.mxu3 %vm305_vm1, %v4954_v0  ;;  %4062 = vmatmul.msk.f32.gmra.mxu2 %vm305_vm1, %v4957_v29  ;;  %v1940_v6 = vadd.f32 %v1576_v8, %v717_v52  ;;  %v4972_v12 = vld [vmem:[%s4284_s24 + $0x360] sm:$0xff] }
 0x169   : > { %3644 = vmatmul.msk.f32.gmra.mxu0 %vm305_vm1, %v4519_v10  ;;  %3853 = vmatmul.msk.f32.gmra.mxu1 %vm305_vm1, %v4750_v3 }
 0x16a   : > { %v4967_v51 = vpop.f32.mrf.mxu3  ;;  %v2643_v50 = vpop.f32.mrf.mxu2 }
 0x16b   : > { %v3007_v56 = vadd.f32 %v2643_v50, %v1940_v6 }
 0x16d   : > { %v3323_v13 = vadd.f32 %v4529_v14, %v3007_v56 }
 0x16e   : > { %v720_v52 = vpop.f32.mrf.mxu0  ;;  %v1579_v10 = vpop.f32.mrf.mxu1 }
 0x16f   : > { %3427 = vst [vmem:[%s4540_s12 + $0xd0] sm:$0xff] %v3323_v13  ;;  %3906 = vmatmul.msk.f32.gmra.mxu3 %vm305_vm1, %v4972_v12  ;;  %4063 = vmatmul.msk.f32.gmra.mxu2 %vm305_vm1, %v4975_v4  ;;  %v1941_v8 = vadd.f32 %v1579_v10, %v720_v52  ;;  %v4990_v13 = vld [vmem:[%s4284_s24 + $0x368] sm:$0xff] }
 0x171   : > { %3645 = vmatmul.msk.f32.gmra.mxu0 %vm305_vm1, %v4546_v21  ;;  %3854 = vmatmul.msk.f32.gmra.mxu1 %vm305_vm1, %v4765_v5 }
 0x172   : > { %v4985_v6 = vpop.f32.mrf.mxu3  ;;  %v2646_v50 = vpop.f32.mrf.mxu2 }
 0x173   : > { %v3008_v56 = vadd.f32 %v2646_v50, %v1941_v8 }
 0x175   : > { %v3324_v40 = vadd.f32 %v4529_v14, %v3008_v56 }
 0x176   : > { %v723_v52 = vpop.f32.mrf.mxu0  ;;  %v1582_v21 = vpop.f32.mrf.mxu1 }
 0x177   : > { %3428 = vst [vmem:[%s4540_s12 + $0xd8] sm:$0xff] %v3324_v40  ;;  %3907 = vmatmul.msk.f32.gmra.mxu3 %vm305_vm1, %v4990_v13  ;;  %4064 = vmatmul.msk.f32.gmra.mxu2 %vm305_vm1, %v4993_v44  ;;  %v1942_v10 = vadd.f32 %v1582_v21, %v723_v52  ;;  %v5008_v40 = vld [vmem:[%s4284_s24 + $0x370] sm:$0xff] }
 0x179   : > { %3646 = vmatmul.msk.f32.gmra.mxu0 %vm305_vm1, %v4564_v33  ;;  %3855 = vmatmul.msk.f32.gmra.mxu1 %vm305_vm1, %v4780_v7 }
 0x17a   : > { %v5003_v8 = vpop.f32.mrf.mxu3  ;;  %v2649_v50 = vpop.f32.mrf.mxu2 }
 0x17b   : > { %v3009_v56 = vadd.f32 %v2649_v50, %v1942_v10 }
 0x17d   : > { %v3325_v32 = vadd.f32 %v4529_v14, %v3009_v56 }
 0x17e   : > { %v726_v52 = vpop.f32.mrf.mxu0  ;;  %v1585_v33 = vpop.f32.mrf.mxu1 }
 0x17f   : > { %3429 = vst [vmem:[%s4540_s12 + $0xe0] sm:$0xff] %v3325_v32  ;;  %3908 = vmatmul.msk.f32.gmra.mxu3 %vm305_vm1, %v5008_v40  ;;  %4065 = vmatmul.msk.f32.gmra.mxu2 %vm305_vm1, %v5011_v36  ;;  %v1943_v21 = vadd.f32 %v1585_v33, %v726_v52  ;;  %v5026_v32 = vld [vmem:[%s4284_s24 + $0x378] sm:$0xff] }
 0x181   : > { %3647 = vmatmul.msk.f32.gmra.mxu0 %vm305_vm1, %v4582_v49  ;;  %3856 = vmatmul.msk.f32.gmra.mxu1 %vm305_vm1, %v4795_v9 }
 0x182   : > { %v5021_v10 = vpop.f32.mrf.mxu3  ;;  %v2652_v50 = vpop.f32.mrf.mxu2 }
 0x183   : > { %v3010_v56 = vadd.f32 %v2652_v50, %v1943_v21 }
 0x185   : > { %v3326_v24 = vadd.f32 %v4529_v14, %v3010_v56 }
 0x186   : > { %v729_v52 = vpop.f32.mrf.mxu0  ;;  %v1588_v49 = vpop.f32.mrf.mxu1 }
 0x187   : > { %3430 = vst [vmem:[%s4540_s12 + $0xe8] sm:$0xff] %v3326_v24  ;;  %3909 = vmatmul.msk.f32.gmra.mxu3 %vm305_vm1, %v5026_v32  ;;  %4066 = vmatmul.msk.f32.gmra.mxu2 %vm305_vm1, %v5029_v28  ;;  %v1944_v33 = vadd.f32 %v1588_v49, %v729_v52  ;;  %v5044_v24 = vld [vmem:[%s4284_s24 + $0x380] sm:$0xff] }
 0x189   : > { %3648 = vmatmul.msk.f32.gmra.mxu0 %vm305_vm1, %v4600_v1  ;;  %3857 = vmatmul.msk.f32.gmra.mxu1 %vm305_vm1, %v4810_v19 }
 0x18a   : > { %v5039_v21 = vpop.f32.mrf.mxu3  ;;  %v2655_v50 = vpop.f32.mrf.mxu2 }
 0x18b   : > { %v3011_v56 = vadd.f32 %v2655_v50, %v1944_v33 }
 0x18d   : > { %v3327_v15 = vadd.f32 %v4529_v14, %v3011_v56 }
 0x18e   : > { %v732_v52 = vpop.f32.mrf.mxu0  ;;  %v1591_v1 = vpop.f32.mrf.mxu1 }
 0x18f   : > { %3431 = vst [vmem:[%s4540_s12 + $0xf0] sm:$0xff] %v3327_v15  ;;  %3910 = vmatmul.msk.f32.gmra.mxu3 %vm305_vm1, %v5044_v24  ;;  %4067 = vmatmul.msk.f32.gmra.mxu2 %vm305_vm1, %v5047_v20  ;;  %v1945_v49 = vadd.f32 %v1591_v1, %v732_v52  ;;  %v5062_v15 = vld [vmem:[%s4284_s24 + $0x388] sm:$0xff] }
 0x191   : > { %3649 = vmatmul.msk.f32.gmra.mxu0 %vm305_vm1, %v4618_v25  ;;  %3858 = vmatmul.msk.f32.gmra.mxu1 %vm305_vm1, %v4825_v31 }
 0x192   : > { %v5057_v33 = vpop.f32.mrf.mxu3  ;;  %v2658_v50 = vpop.f32.mrf.mxu2 }
 0x193   : > { %v3012_v56 = vadd.f32 %v2658_v50, %v1945_v49 }
 0x195   : > { %v3328_v62 = vadd.f32 %v4529_v14, %v3012_v56 }
 0x196   : > { %v735_v52 = vpop.f32.mrf.mxu0  ;;  %v1594_v25 = vpop.f32.mrf.mxu1 }
 0x197   : > { %3432 = vst [vmem:[%s4540_s12 + $0xf8] sm:$0xff] %v3328_v62  ;;  %3911 = vmatmul.msk.f32.gmra.mxu3 %vm305_vm1, %v5062_v15  ;;  %4068 = vmatmul.msk.f32.gmra.mxu2 %vm305_vm1, %v5065_v2  ;;  %v1946_v1 = vadd.f32 %v1594_v25, %v735_v52  ;;  %v5080_v62 = vld [vmem:[%s4284_s24 + $0x390] sm:$0xff] }
 0x199   : > { %3650 = vmatmul.msk.f32.gmra.mxu0 %vm305_vm1, %v4636_v43  ;;  %3859 = vmatmul.msk.f32.gmra.mxu1 %vm305_vm1, %v4840_v47 }
 0x19a   : > { %v5075_v49 = vpop.f32.mrf.mxu3  ;;  %v2661_v50 = vpop.f32.mrf.mxu2 }
 0x19b   : > { %v3013_v56 = vadd.f32 %v2661_v50, %v1946_v1 }
 0x19d   : > { %v3329_v42 = vadd.f32 %v4529_v14, %v3013_v56 }
 0x19e   : > { %v738_v52 = vpop.f32.mrf.mxu0  ;;  %v1597_v43 = vpop.f32.mrf.mxu1 }
 0x19f   : > { %3433 = vst [vmem:[%s4540_s12 + $0x100] sm:$0xff] %v3329_v42  ;;  %3912 = vmatmul.msk.f32.gmra.mxu3 %vm305_vm1, %v5080_v62  ;;  %4069 = vmatmul.msk.f32.gmra.mxu2 %vm305_vm1, %v5083_v58  ;;  %v1947_v25 = vadd.f32 %v1597_v43, %v738_v52  ;;  %v5098_v42 = vld [vmem:[%s4284_s24 + $0x398] sm:$0xff] }
 0x1a1   : > { %3651 = vmatmul.msk.f32.gmra.mxu0 %vm305_vm1, %v4654_v11  ;;  %3860 = vmatmul.msk.f32.gmra.mxu1 %vm305_vm1, %v4855_v63 }
 0x1a2   : > { %v5093_v1 = vpop.f32.mrf.mxu3  ;;  %v2664_v50 = vpop.f32.mrf.mxu2 }
 0x1a3   : > { %5636 = vst [vmem:[#allocation22_spill] sm:$0xff] %v5093_v1  ;;  %v3014_v56 = vadd.f32 %v2664_v50, %v1947_v25 }
 0x1a5   : > { %v3330_v54 = vadd.f32 %v4529_v14, %v3014_v56 }
 0x1a6   : > { %v741_v52 = vpop.f32.mrf.mxu0  ;;  %v1600_v11 = vpop.f32.mrf.mxu1 }
 0x1a7   : > { %3434 = vst [vmem:[%s4540_s12 + $0x108] sm:$0xff] %v3330_v54  ;;  %3913 = vmatmul.msk.f32.gmra.mxu3 %vm305_vm1, %v5098_v42  ;;  %4070 = vmatmul.msk.f32.gmra.mxu2 %vm305_vm1, %v5101_v34  ;;  %v1948_v43 = vadd.f32 %v1600_v11, %v741_v52  ;;  %v5116_v54 = vld [vmem:[%s4284_s24 + $0x3a0] sm:$0xff] }
 0x1a9   : > { %3652 = vmatmul.msk.f32.gmra.mxu0 %vm305_vm1, %v4672_v46  ;;  %3861 = vmatmul.msk.f32.gmra.mxu1 %vm305_vm1, %v4870_v23 }
 0x1aa   : > { %v5111_v25 = vpop.f32.mrf.mxu3  ;;  %v2667_v50 = vpop.f32.mrf.mxu2 }
 0x1ab   : > { %5637 = vst [vmem:[#allocation23_spill] sm:$0xff] %v5111_v25  ;;  %v3015_v56 = vadd.f32 %v2667_v50, %v1948_v43 }
 0x1ad   : > { %v3331_v1 = vadd.f32 %v4529_v14, %v3015_v56 }
 0x1ae   : > { %v744_v18 = vpop.f32.mrf.mxu0  ;;  %v1603_v46 = vpop.f32.mrf.mxu1 }
 0x1af   : > { %3435 = vst [vmem:[%s4540_s12 + $0x110] sm:$0xff] %v3331_v1  ;;  %3914 = vmatmul.msk.f32.gmra.mxu3 %vm305_vm1, %v5116_v54  ;;  %4071 = vmatmul.msk.f32.gmra.mxu2 %vm305_vm1, %v5119_v45  ;;  %v1949_v52 = vadd.f32 %v1603_v46, %v744_v18  ;;  %v5134_v1 = vld [vmem:[%s4284_s24 + $0x270] sm:$0xff] }
 0x1b1   : > { %3653 = vmatmul.msk.f32.gmra.mxu0 %vm305_vm1, %v4690_v55  ;;  %3862 = vmatmul.msk.f32.gmra.mxu1 %vm305_vm1, %v4885_v39 }
 0x1b2   : > { %v5129_v11 = vpop.f32.mrf.mxu3  ;;  %v2670_v43 = vpop.f32.mrf.mxu2 }
 0x1b3   : > { %5638 = vst [vmem:[#allocation24_spill] sm:$0xff] %v5129_v11  ;;  %v3016_v50 = vadd.f32 %v2670_v43, %v1949_v52 }
 0x1b5   : > { %v3332_v56 = vadd.f32 %v4529_v14, %v3016_v50  ;;  %v5149_v50 = vld [vmem:[%s4284_s24 + $0x278] sm:$0xff] }
 0x1b6   : > { %v747_v25 = vpop.f32.mrf.mxu0  ;;  %v1606_v18 = vpop.f32.mrf.mxu1 }
 0x1b7   : > { %3436 = vst [vmem:[%s4540_s12 + $0x118] sm:$0xff] %v3332_v56  ;;  %4072 = vmatmul.msk.f32.gmra.mxu2 %vm305_vm1, %v5134_v1  ;;  %4098 = vmatmul.msk.f32.vlgmr.msra.gmra.mxu3 %vm305_vm1, %v4900_v61  ;;  %v1950_v55 = vadd.f32 %v1606_v18, %v747_v25 }
 0x1b9   : > { %3654 = vmatmul.msk.f32.gmra.mxu0 %vm305_vm1, %v4705_v26  ;;  %3863 = vmatmul.msk.f32.gmra.mxu1 %vm305_vm1, %v4903_v53 }
 0x1ba   : > { %v5144_v46 = vpop.f32.mrf.mxu3  ;;  %v2673_v52 = vpop.f32.mrf.mxu2 }
 0x1bb   : > { %v3017_v43 = vadd.f32 %v2673_v52, %v1950_v55  ;;  %v5164_v52 = vld [vmem:[%s4284_s24 + $0x280] sm:$0xff] }
 0x1bd   : > { %v3333_v56 = vadd.f32 %v4529_v14, %v3017_v43 }
 0x1be   : > { %v750_v11 = vpop.f32.mrf.mxu0  ;;  %v1609_v26 = vpop.f32.mrf.mxu1 }
 0x1bf   : > { %3437 = vst [vmem:[%s4540_s12 + $0x120] sm:$0xff] %v3333_v56  ;;  %4073 = vmatmul.msk.f32.gmra.mxu2 %vm305_vm1, %v5149_v50  ;;  %4099 = vmatmul.msk.f32.gmra.mxu3 %vm305_vm1, %v4918_v37  ;;  %v1951_v61 = vadd.f32 %v1609_v26, %v750_v11 }
 0x1c1   : > { %3655 = vmatmul.msk.f32.gmra.mxu0 %vm305_vm1, %v4720_v59  ;;  %3864 = vmatmul.msk.f32.gmra.mxu1 %vm305_vm1, %v4921_v60 }
 0x1c2   : > { %v5159_v25 = vpop.f32.mrf.mxu3  ;;  %v2676_v18 = vpop.f32.mrf.mxu2 }
 0x1c3   : > { %v3018_v55 = vadd.f32 %v2676_v18, %v1951_v61  ;;  %v5179_v61 = vld [vmem:[%s4284_s24 + $0x288] sm:$0xff]  ;;  %v5184_v18 = vld [vmem:[%s5615_s2] ss:$0 sm:$0xff] }
 0x1c5   : > { %v3334_v43 = vadd.f32 %v4529_v14, %v3018_v55 }
 0x1c6   : > { %v753_v56 = vpop.f32.mrf.mxu0  ;;  %v1612_v59 = vpop.f32.mrf.mxu1 }
 0x1c7   : > { %3438 = vst [vmem:[%s4540_s12 + $0x128] sm:$0xff] %v3334_v43  ;;  %4074 = vmatmul.msk.f32.gmra.mxu2 %vm305_vm1, %v5164_v52  ;;  %4100 = vmatmul.msk.f32.gmra.mxu3 %vm305_vm1, %v4936_v48  ;;  %v1952_v37 = vadd.f32 %v1612_v59, %v753_v56 }
 0x1c9   : > { %3656 = vmatmul.msk.f32.gmra.mxu0 %vm305_vm1, %v4735_v30  ;;  %3865 = vmatmul.msk.f32.gmra.mxu1 %vm305_vm1, %v4939_v22 }
 0x1ca   : > { %v5174_v11 = vpop.f32.mrf.mxu3  ;;  %v2679_v26 = vpop.f32.mrf.mxu2 }
 0x1cb   : > { %v3019_v14 = vadd.f32 %v2679_v26, %v1952_v37  ;;  %v5199_v26 = vld [vmem:[%s4284_s24 + $0x290] sm:$0xff] }
 0x1cd   : > { %v3335_v48 = vadd.f32 %v5184_v18, %v3019_v14 }
 0x1ce   : > { %v756_v55 = vpop.f32.mrf.mxu0  ;;  %v1615_v30 = vpop.f32.mrf.mxu1 }
 0x1cf   : > { %3439 = vst [vmem:[%s4540_s12 + $0x130] sm:$0xff] %v3335_v48  ;;  %4075 = vmatmul.msk.f32.gmra.mxu2 %vm305_vm1, %v5179_v61  ;;  %4101 = vmatmul.msk.f32.gmra.mxu3 %vm305_vm1, %v4954_v0  ;;  %v1953_v43 = vadd.f32 %v1615_v30, %v756_v55 }
 0x1d1   : > { %3657 = vmatmul.msk.f32.gmra.mxu0 %vm305_vm1, %v4750_v3  ;;  %3866 = vmatmul.msk.f32.gmra.mxu1 %vm305_vm1, %v4957_v29 }
 0x1d2   : > { %v5194_v56 = vpop.f32.mrf.mxu3  ;;  %v2682_v59 = vpop.f32.mrf.mxu2 }
 0x1d3   : > { %v3020_v37 = vadd.f32 %v2682_v59, %v1953_v43  ;;  %v5214_v59 = vld [vmem:[%s4284_s24 + $0x298] sm:$0xff] }
 0x1d5   : > { %v3336_v14 = vadd.f32 %v5184_v18, %v3020_v37 }
 0x1d6   : > { %v759_v48 = vpop.f32.mrf.mxu0  ;;  %v1618_v3 = vpop.f32.mrf.mxu1 }
 0x1d7   : > { %3440 = vst [vmem:[%s4540_s12 + $0x138] sm:$0xff] %v3336_v14  ;;  %4076 = vmatmul.msk.f32.gmra.mxu2 %vm305_vm1, %v5199_v26  ;;  %4102 = vmatmul.msk.f32.gmra.mxu3 %vm305_vm1, %v4972_v12  ;;  %v1954_v0 = vadd.f32 %v1618_v3, %v759_v48 }
 0x1d9   : > { %3658 = vmatmul.msk.f32.gmra.mxu0 %vm305_vm1, %v4765_v5  ;;  %3867 = vmatmul.msk.f32.gmra.mxu1 %vm305_vm1, %v4975_v4 }
 0x1da   : > { %v5209_v55 = vpop.f32.mrf.mxu3  ;;  %v2685_v30 = vpop.f32.mrf.mxu2 }
 0x1db   : > { %v3021_v43 = vadd.f32 %v2685_v30, %v1954_v0  ;;  %v5229_v30 = vld [vmem:[%s4284_s24 + $0x2a0] sm:$0xff] }
 0x1dd   : > { %v3337_v37 = vadd.f32 %v5184_v18, %v3021_v43 }
 0x1de   : > { %v762_v14 = vpop.f32.mrf.mxu0  ;;  %v1621_v5 = vpop.f32.mrf.mxu1 }
 0x1df   : > { %3441 = vst [vmem:[%s4540_s12 + $0x140] sm:$0xff] %v3337_v37  ;;  %4077 = vmatmul.msk.f32.gmra.mxu2 %vm305_vm1, %v5214_v59  ;;  %4103 = vmatmul.msk.f32.gmra.mxu3 %vm305_vm1, %v4990_v13  ;;  %v1955_v12 = vadd.f32 %v1621_v5, %v762_v14 }
 0x1e1   : > { %3659 = vmatmul.msk.f32.gmra.mxu0 %vm305_vm1, %v4780_v7  ;;  %3868 = vmatmul.msk.f32.gmra.mxu1 %vm305_vm1, %v4993_v44 }
 0x1e2   : > { %v5224_v48 = vpop.f32.mrf.mxu3  ;;  %v2688_v3 = vpop.f32.mrf.mxu2 }
 0x1e3   : > { %v3022_v0 = vadd.f32 %v2688_v3, %v1955_v12  ;;  %v5244_v3 = vld [vmem:[%s4284_s24 + $0x2a8] sm:$0xff] }
 0x1e5   : > { %v3338_v43 = vadd.f32 %v5184_v18, %v3022_v0 }
 0x1e6   : > { %v765_v37 = vpop.f32.mrf.mxu0  ;;  %v1624_v7 = vpop.f32.mrf.mxu1 }
 0x1e7   : > { %3442 = vst [vmem:[%s4540_s12 + $0x148] sm:$0xff] %v3338_v43  ;;  %4078 = vmatmul.msk.f32.gmra.mxu2 %vm305_vm1, %v5229_v30  ;;  %4104 = vmatmul.msk.f32.gmra.mxu3 %vm305_vm1, %v5008_v40  ;;  %v1956_v13 = vadd.f32 %v1624_v7, %v765_v37 }
 0x1e9   : > { %3660 = vmatmul.msk.f32.gmra.mxu0 %vm305_vm1, %v4795_v9  ;;  %3869 = vmatmul.msk.f32.gmra.mxu1 %vm305_vm1, %v5011_v36 }
 0x1ea   : > { %v5239_v14 = vpop.f32.mrf.mxu3  ;;  %v2691_v5 = vpop.f32.mrf.mxu2 }
 0x1eb   : > { %v3023_v12 = vadd.f32 %v2691_v5, %v1956_v13  ;;  %v5259_v5 = vld [vmem:[%s4284_s24 + $0x2b0] sm:$0xff] }
 0x1ed   : > { %v3339_v0 = vadd.f32 %v5184_v18, %v3023_v12 }
 0x1ee   : > { %v768_v43 = vpop.f32.mrf.mxu0  ;;  %v1627_v9 = vpop.f32.mrf.mxu1 }
 0x1ef   : > { %3443 = vst [vmem:[%s4540_s12 + $0x150] sm:$0xff] %v3339_v0  ;;  %4079 = vmatmul.msk.f32.gmra.mxu2 %vm305_vm1, %v5244_v3  ;;  %4105 = vmatmul.msk.f32.gmra.mxu3 %vm305_vm1, %v5026_v32  ;;  %v1957_v40 = vadd.f32 %v1627_v9, %v768_v43 }
 0x1f1   : > { %3661 = vmatmul.msk.f32.gmra.mxu0 %vm305_vm1, %v4810_v19  ;;  %3870 = vmatmul.msk.f32.gmra.mxu1 %vm305_vm1, %v5029_v28 }
 0x1f2   : > { %v5254_v37 = vpop.f32.mrf.mxu3  ;;  %v2694_v7 = vpop.f32.mrf.mxu2 }
 0x1f3   : > { %v3024_v13 = vadd.f32 %v2694_v7, %v1957_v40  ;;  %v5274_v7 = vld [vmem:[%s4284_s24 + $0x2b8] sm:$0xff] }
 0x1f5   : > { %v3340_v12 = vadd.f32 %v5184_v18, %v3024_v13 }
 0x1f6   : > { %v771_v0 = vpop.f32.mrf.mxu0  ;;  %v1630_v19 = vpop.f32.mrf.mxu1 }
 0x1f7   : > { %3444 = vst [vmem:[%s4540_s12 + $0x158] sm:$0xff] %v3340_v12  ;;  %4080 = vmatmul.msk.f32.gmra.mxu2 %vm305_vm1, %v5259_v5  ;;  %4106 = vmatmul.msk.f32.gmra.mxu3 %vm305_vm1, %v5044_v24  ;;  %v1958_v32 = vadd.f32 %v1630_v19, %v771_v0 }
 0x1f9   : > { %3662 = vmatmul.msk.f32.gmra.mxu0 %vm305_vm1, %v4825_v31  ;;  %3871 = vmatmul.msk.f32.gmra.mxu1 %vm305_vm1, %v5047_v20 }
 0x1fa   : > { %v5269_v43 = vpop.f32.mrf.mxu3  ;;  %v2697_v9 = vpop.f32.mrf.mxu2 }
 0x1fb   : > { %v3025_v40 = vadd.f32 %v2697_v9, %v1958_v32  ;;  %v5289_v9 = vld [vmem:[%s4284_s24 + $0x2c0] sm:$0xff] }
 0x1fd   : > { %v3341_v13 = vadd.f32 %v5184_v18, %v3025_v40 }
 0x1fe   : > { %v774_v12 = vpop.f32.mrf.mxu0  ;;  %v1633_v31 = vpop.f32.mrf.mxu1 }
 0x1ff   : > { %3445 = vst [vmem:[%s4540_s12 + $0x160] sm:$0xff] %v3341_v13  ;;  %4081 = vmatmul.msk.f32.gmra.mxu2 %vm305_vm1, %v5274_v7  ;;  %4107 = vmatmul.msk.f32.gmra.mxu3 %vm305_vm1, %v5062_v15  ;;  %v1959_v24 = vadd.f32 %v1633_v31, %v774_v12 }
 0x201   : > { %3663 = vmatmul.msk.f32.gmra.mxu0 %vm305_vm1, %v4840_v47  ;;  %3872 = vmatmul.msk.f32.gmra.mxu1 %vm305_vm1, %v5065_v2 }
 0x202   : > { %v5284_v0 = vpop.f32.mrf.mxu3  ;;  %v2700_v19 = vpop.f32.mrf.mxu2 }
 0x203   : > { %v3026_v32 = vadd.f32 %v2700_v19, %v1959_v24  ;;  %v5304_v19 = vld [vmem:[%s4284_s24 + $0x2c8] sm:$0xff] }
 0x205   : > { %v3342_v40 = vadd.f32 %v5184_v18, %v3026_v32 }
 0x206   : > { %v777_v13 = vpop.f32.mrf.mxu0  ;;  %v1636_v47 = vpop.f32.mrf.mxu1 }
 0x207   : > { %3446 = vst [vmem:[%s4540_s12 + $0x168] sm:$0xff] %v3342_v40  ;;  %4082 = vmatmul.msk.f32.gmra.mxu2 %vm305_vm1, %v5289_v9  ;;  %4108 = vmatmul.msk.f32.gmra.mxu3 %vm305_vm1, %v5080_v62  ;;  %v1960_v15 = vadd.f32 %v1636_v47, %v777_v13 }
 0x209   : > { %3664 = vmatmul.msk.f32.gmra.mxu0 %vm305_vm1, %v4855_v63  ;;  %3873 = vmatmul.msk.f32.gmra.mxu1 %vm305_vm1, %v5083_v58 }
 0x20a   : > { %v5299_v12 = vpop.f32.mrf.mxu3  ;;  %v2703_v31 = vpop.f32.mrf.mxu2 }
 0x20b   : > { %v3027_v24 = vadd.f32 %v2703_v31, %v1960_v15  ;;  %v5319_v31 = vld [vmem:[%s4284_s24 + $0x2d0] sm:$0xff] }
 0x20d   : > { %v3343_v32 = vadd.f32 %v5184_v18, %v3027_v24 }
 0x20e   : > { %v780_v40 = vpop.f32.mrf.mxu0  ;;  %v1639_v63 = vpop.f32.mrf.mxu1 }
 0x20f   : > { %3447 = vst [vmem:[%s4540_s12 + $0x170] sm:$0xff] %v3343_v32  ;;  %4083 = vmatmul.msk.f32.gmra.mxu2 %vm305_vm1, %v5304_v19  ;;  %4109 = vmatmul.msk.f32.gmra.mxu3 %vm305_vm1, %v5098_v42  ;;  %v1961_v62 = vadd.f32 %v1639_v63, %v780_v40 }
 0x211   : > { %3665 = vmatmul.msk.f32.gmra.mxu0 %vm305_vm1, %v4870_v23  ;;  %3874 = vmatmul.msk.f32.gmra.mxu1 %vm305_vm1, %v5101_v34 }
 0x212   : > { %v5314_v13 = vpop.f32.mrf.mxu3  ;;  %v2706_v47 = vpop.f32.mrf.mxu2 }
 0x213   : > { %v3028_v15 = vadd.f32 %v2706_v47, %v1961_v62  ;;  %v3980_v47 = vld [vmem:[%s4284_s24 + $0x2d8] sm:$0xff] }
 0x215   : > { %v3344_v24 = vadd.f32 %v5184_v18, %v3028_v15  ;;  %v4006_v15 = vld [vmem:[%s4284_s24 + $0x3a8] sm:$0xff] }
 0x216   : > { %v783_v42 = vpop.f32.mrf.mxu0  ;;  %v1642_v23 = vpop.f32.mrf.mxu1 }
 0x217   : > { %3448 = vst [vmem:[%s4540_s12 + $0x178] sm:$0xff] %v3344_v24  ;;  %4084 = vmatmul.msk.f32.gmra.mxu2 %vm305_vm1, %v5319_v31  ;;  %4110 = vmatmul.msk.f32.gmra.mxu3 %vm305_vm1, %v5116_v54  ;;  %v1962_v32 = vadd.f32 %v1642_v23, %v783_v42 }
 0x219   : > { %3666 = vmatmul.msk.f32.gmra.mxu0 %vm305_vm1, %v4885_v39  ;;  %3875 = vmatmul.msk.f32.gmra.mxu1 %vm305_vm1, %v5119_v45 }
 0x21a   : > { %v5329_v40 = vpop.f32.mrf.mxu3  ;;  %v2709_v63 = vpop.f32.mrf.mxu2 }
 0x21b   : > { %v3029_v62 = vadd.f32 %v2709_v63, %v1962_v32 }
 0x21d   : > { %v3345_v24 = vadd.f32 %v5184_v18, %v3029_v62  ;;  %v3981_v62 = vld [vmem:[%s4284_s24 + $0x2e0] sm:$0xff] }
 0x21e   : > { %v786_v54 = vpop.f32.mrf.mxu0  ;;  %v1645_v39 = vpop.f32.mrf.mxu1 }
 0x21f   : > { %3449 = vst [vmem:[%s4540_s12 + $0x180] sm:$0xff] %v3345_v24  ;;  %4085 = vmatmul.msk.f32.gmra.mxu2 %vm305_vm1, %v3980_v47  ;;  %4111 = vmatmul.msk.f32.gmra.mxu3 %vm305_vm1, %v4006_v15  ;;  %v1963_v42 = vadd.f32 %v1645_v39, %v786_v54  ;;  %v4007_v24 = vld [vmem:[%s4284_s24 + $0x3b0] sm:$0xff] }
 0x221   : > { %3667 = vmatmul.msk.f32.gmra.mxu0 %vm305_vm1, %v4903_v53  ;;  %3876 = vmatmul.msk.f32.gmra.mxu1 %vm305_vm1, %v5134_v1 }
 0x222   : > { %v5341_v23 = vpop.f32.mrf.mxu3  ;;  %v2712_v32 = vpop.f32.mrf.mxu2 }
 0x223   : > { %v3030_v63 = vadd.f32 %v2712_v32, %v1963_v42  ;;  %v3982_v32 = vld [vmem:[%s4284_s24 + $0x2e8] sm:$0xff] }
 0x225   : > { %v3346_v47 = vadd.f32 %v5184_v18, %v3030_v63  ;;  %v4008_v63 = vld [vmem:[%s4284_s24 + $0x3b8] sm:$0xff] }
 0x226   : > { %v789_v15 = vpop.f32.mrf.mxu0  ;;  %v1648_v53 = vpop.f32.mrf.mxu1 }
 0x227   : > { %3450 = vst [vmem:[%s4540_s12 + $0x188] sm:$0xff] %v3346_v47  ;;  %4086 = vmatmul.msk.f32.gmra.mxu2 %vm305_vm1, %v3981_v62  ;;  %4112 = vmatmul.msk.f32.gmra.mxu3 %vm305_vm1, %v4007_v24  ;;  %v1964_v54 = vadd.f32 %v1648_v53, %v789_v15 }
 0x229   : > { %3668 = vmatmul.msk.f32.gmra.mxu0 %vm305_vm1, %v4921_v60  ;;  %3877 = vmatmul.msk.f32.gmra.mxu1 %vm305_vm1, %v5149_v50 }
 0x22a   : > { %v5353_v1 = vpop.f32.mrf.mxu3  ;;  %v2715_v39 = vpop.f32.mrf.mxu2 }
 0x22b   : > { %v3031_v42 = vadd.f32 %v2715_v39, %v1964_v54  ;;  %v3983_v54 = vld [vmem:[%s4284_s24 + $0x2f0] sm:$0xff]  ;;  %v4009_v39 = vld [vmem:[%s4284_s24 + $0x3c0] sm:$0xff] }
 0x22d   : > { %v3347_v62 = vadd.f32 %v5184_v18, %v3031_v42 }
 0x22e   : > { %v792_v24 = vpop.f32.mrf.mxu0  ;;  %v1651_v60 = vpop.f32.mrf.mxu1 }
 0x22f   : > { %3451 = vst [vmem:[%s4540_s12 + $0x190] sm:$0xff] %v3347_v62  ;;  %4087 = vmatmul.msk.f32.gmra.mxu2 %vm305_vm1, %v3982_v32  ;;  %4113 = vmatmul.msk.f32.gmra.mxu3 %vm305_vm1, %v4008_v63  ;;  %v1965_v47 = vadd.f32 %v1651_v60, %v792_v24  ;;  %v1992_v62 = vadd.f32 %v4967_v51, %v4533_v16 }
 0x231   : > { %3669 = vmatmul.msk.f32.gmra.mxu0 %vm305_vm1, %v4939_v22  ;;  %3878 = vmatmul.msk.f32.gmra.mxu1 %vm305_vm1, %v5164_v52 }
 0x232   : > { %v5365_v50 = vpop.f32.mrf.mxu3  ;;  %v2718_v15 = vpop.f32.mrf.mxu2 }
 0x233   : > { %v3032_v53 = vadd.f32 %v2718_v15, %v1965_v47  ;;  %v3984_v15 = vld [vmem:[%s4284_s24 + $0x2f8] sm:$0xff] }
 0x235   : > { %v3348_v42 = vadd.f32 %v5184_v18, %v3032_v53  ;;  %v4010_v53 = vld [vmem:[%s4284_s24 + $0x3c8] sm:$0xff] }
 0x236   : > { %v795_v32 = vpop.f32.mrf.mxu0  ;;  %v1654_v22 = vpop.f32.mrf.mxu1 }
 0x237   : > { %3452 = vst [vmem:[%s4540_s12 + $0x198] sm:$0xff] %v3348_v42  ;;  %4088 = vmatmul.msk.f32.gmra.mxu2 %vm305_vm1, %v3983_v54  ;;  %4114 = vmatmul.msk.f32.gmra.mxu3 %vm305_vm1, %v4009_v39  ;;  %v1966_v63 = vadd.f32 %v1654_v22, %v795_v32 }
 0x239   : > { %3670 = vmatmul.msk.f32.gmra.mxu0 %vm305_vm1, %v4957_v29  ;;  %3879 = vmatmul.msk.f32.gmra.mxu1 %vm305_vm1, %v5179_v61  ;;  %v1993_v61 = vadd.f32 %v4985_v6, %v4556_v27 }
 0x23a   : > { %v2721_v52 = vpop.f32.mrf.mxu2  ;;  %v2799_v24 = vpop.f32.mrf.mxu3 }
 0x23b   : > { %v3033_v60 = vadd.f32 %v2721_v52, %v1966_v63  ;;  %v3059_v47 = vadd.f32 %v2799_v24, %v1992_v62  ;;  %v3985_v62 = vld [vmem:[%s4284_s24 + $0x300] sm:$0xff]  ;;  %v4011_v52 = vld [vmem:[%s4284_s24 + $0x3d0] sm:$0xff] }
 0x23d   : > { %v3349_v54 = vadd.f32 %v5184_v18, %v3033_v60  ;;  %v3375_v39 = vadd.f32 %v5184_v18, %v3059_v47 }
 0x23e   : > { %v798_v16 = vpop.f32.mrf.mxu0  ;;  %v1657_v29 = vpop.f32.mrf.mxu1 }
 0x23f   : > { %3453 = vst [vmem:[%s4540_s12 + $0x1a0] sm:$0xff] %v3349_v54  ;;  %4089 = vmatmul.msk.f32.gmra.mxu2 %vm305_vm1, %v3984_v15  ;;  %4115 = vmatmul.msk.f32.gmra.mxu3 %vm305_vm1, %v4010_v53  ;;  %v1967_v51 = vadd.f32 %v1657_v29, %v798_v16  ;;  %v4012_v16 = vld [vmem:[%s4284_s24 + $0x3d8] sm:$0xff] }
 0x240   : > { %3479 = vst [vmem:[%s4540_s12 + $0x270] sm:$0xff] %v3375_v39  ;;  %v3986_v39 = vld [vmem:[%s4284_s24 + $0x308] sm:$0xff] }
 0x241   : > { %3671 = vmatmul.msk.f32.gmra.mxu0 %vm305_vm1, %v4975_v4  ;;  %3880 = vmatmul.msk.f32.gmra.mxu1 %vm305_vm1, %v5199_v26  ;;  %v1994_v26 = vadd.f32 %v5003_v8, %v4574_v41 }
 0x242   : > { %v2724_v42 = vpop.f32.mrf.mxu2  ;;  %v2802_v32 = vpop.f32.mrf.mxu3 }
 0x243   : > { %v3034_v22 = vadd.f32 %v2724_v42, %v1967_v51  ;;  %v3060_v63 = vadd.f32 %v2802_v32, %v1993_v61 }
 0x245   : > { %v3350_v24 = vadd.f32 %v5184_v18, %v3034_v22  ;;  %v3376_v60 = vadd.f32 %v5184_v18, %v3060_v63  ;;  %v3987_v63 = vld [vmem:[%s4284_s24 + $0x310] sm:$0xff] }
 0x246   : > { %v801_v27 = vpop.f32.mrf.mxu0  ;;  %v1660_v4 = vpop.f32.mrf.mxu1 }
 0x247   : > { %3454 = vst [vmem:[%s4540_s12 + $0x1a8] sm:$0xff] %v3350_v24  ;;  %4090 = vmatmul.msk.f32.gmra.mxu2 %vm305_vm1, %v3985_v62  ;;  %4116 = vmatmul.msk.f32.gmra.mxu3 %vm305_vm1, %v4011_v52  ;;  %v1968_v6 = vadd.f32 %v1660_v4, %v801_v27  ;;  %v4013_v62 = vld [vmem:[%s4284_s24 + $0x3e0] sm:$0xff] }
 0x248   : > { %3480 = vst [vmem:[%s4540_s12 + $0x278] sm:$0xff] %v3376_v60 }
 0x249   : > { %3672 = vmatmul.msk.f32.gmra.mxu0 %vm305_vm1, %v4993_v44  ;;  %3881 = vmatmul.msk.f32.gmra.mxu1 %vm305_vm1, %v5214_v59  ;;  %v1995_v59 = vadd.f32 %v5021_v10, %v4592_v57 }
 0x24a   : > { %v2727_v47 = vpop.f32.mrf.mxu2  ;;  %v2805_v15 = vpop.f32.mrf.mxu3 }
 0x24b   : > { %v3035_v53 = vadd.f32 %v2727_v47, %v1968_v6  ;;  %v3061_v54 = vadd.f32 %v2805_v15, %v1994_v26  ;;  %v3988_v26 = vld [vmem:[%s4284_s24 + $0x318] sm:$0xff]  ;;  %v4014_v47 = vld [vmem:[%s4284_s24 + $0x3e8] sm:$0xff] }
 0x24d   : > { %v3351_v29 = vadd.f32 %v5184_v18, %v3035_v53  ;;  %v3377_v51 = vadd.f32 %v5184_v18, %v3061_v54 }
 0x24e   : > { %v804_v41 = vpop.f32.mrf.mxu0  ;;  %v1663_v44 = vpop.f32.mrf.mxu1 }
 0x24f   : > { %3455 = vst [vmem:[%s4540_s12 + $0x1b0] sm:$0xff] %v3351_v29  ;;  %4091 = vmatmul.msk.f32.gmra.mxu2 %vm305_vm1, %v3986_v39  ;;  %4117 = vmatmul.msk.f32.gmra.mxu3 %vm305_vm1, %v4012_v16  ;;  %v1969_v8 = vadd.f32 %v1663_v44, %v804_v41  ;;  %v4015_v41 = vld [vmem:[%s4284_s24 + $0x3f0] sm:$0xff] }
 0x250   : > { %3481 = vst [vmem:[%s4540_s12 + $0x280] sm:$0xff] %v3377_v51  ;;  %v3989_v51 = vld [vmem:[%s4284_s24 + $0x320] sm:$0xff] }
 0x251   : > { %3673 = vmatmul.msk.f32.gmra.mxu0 %vm305_vm1, %v5011_v36  ;;  %3882 = vmatmul.msk.f32.gmra.mxu1 %vm305_vm1, %v5229_v30  ;;  %v1996_v30 = vadd.f32 %v5039_v21, %v4610_v17 }
 0x252   : > { %v2730_v61 = vpop.f32.mrf.mxu2  ;;  %v2808_v42 = vpop.f32.mrf.mxu3 }
 0x253   : > { %v3036_v32 = vadd.f32 %v2730_v61, %v1969_v8  ;;  %v3062_v22 = vadd.f32 %v2808_v42, %v1995_v59 }
 0x255   : > { %v3352_v52 = vadd.f32 %v5184_v18, %v3036_v32  ;;  %v3378_v24 = vadd.f32 %v5184_v18, %v3062_v22  ;;  %v3990_v22 = vld [vmem:[%s4284_s24 + $0x328] sm:$0xff] }
 0x256   : > { %v807_v57 = vpop.f32.mrf.mxu0  ;;  %v1666_v36 = vpop.f32.mrf.mxu1 }
 0x257   : > { %3456 = vst [vmem:[%s4540_s12 + $0x1b8] sm:$0xff] %v3352_v52  ;;  %4092 = vmatmul.msk.f32.gmra.mxu2 %vm305_vm1, %v3987_v63  ;;  %4118 = vmatmul.msk.f32.gmra.mxu3 %vm305_vm1, %v4013_v62  ;;  %v1970_v10 = vadd.f32 %v1666_v36, %v807_v57  ;;  %v4016_v63 = vld [vmem:[%s4284_s24 + $0x3f8] sm:$0xff] }
 0x258   : > { %3482 = vst [vmem:[%s4540_s12 + $0x288] sm:$0xff] %v3378_v24  ;;  %v5640_v24 = vld [vmem:[#allocation22_spill] sm:$0xff] }
 0x259   : > { %3674 = vmatmul.msk.f32.gmra.mxu0 %vm305_vm1, %v5029_v28  ;;  %3883 = vmatmul.msk.f32.gmra.mxu1 %vm305_vm1, %v5244_v3  ;;  %v1997_v3 = vadd.f32 %v5057_v33, %v4628_v35 }
 0x25a   : > { %v2733_v60 = vpop.f32.mrf.mxu2  ;;  %v2811_v27 = vpop.f32.mrf.mxu3 }
 0x25b   : > { %v3037_v4 = vadd.f32 %v2733_v60, %v1970_v10  ;;  %v3063_v6 = vadd.f32 %v2811_v27, %v1996_v30  ;;  %v3991_v27 = vld [vmem:[%s4284_s24 + $0x330] sm:$0xff] }
 0x25d   : > { %v3353_v15 = vadd.f32 %v5184_v18, %v3037_v4  ;;  %v3379_v53 = vadd.f32 %v5184_v18, %v3063_v6  ;;  %v4017_v4 = vld [vmem:[%s4284_s24 + $0x400] sm:$0xff] }
 0x25e   : > { %v810_v17 = vpop.f32.mrf.mxu0  ;;  %v1669_v28 = vpop.f32.mrf.mxu1 }
 0x25f   : > { %3457 = vst [vmem:[%s4540_s12 + $0x1c0] sm:$0xff] %v3353_v15  ;;  %4093 = vmatmul.msk.f32.gmra.mxu2 %vm305_vm1, %v3988_v26  ;;  %4119 = vmatmul.msk.f32.gmra.mxu3 %vm305_vm1, %v4014_v47  ;;  %v1971_v21 = vadd.f32 %v1669_v28, %v810_v17  ;;  %v5641_v15 = vld [vmem:[#allocation4_spill] sm:$0xff] }
 0x260   : > { %3483 = vst [vmem:[%s4540_s12 + $0x290] sm:$0xff] %v3379_v53  ;;  %v5642_v53 = vld [vmem:[#allocation23_spill] sm:$0xff] }
 0x261   : > { %3675 = vmatmul.msk.f32.gmra.mxu0 %vm305_vm1, %v5047_v20  ;;  %3884 = vmatmul.msk.f32.gmra.mxu1 %vm305_vm1, %v5259_v5  ;;  %v1998_v5 = vadd.f32 %v5075_v49, %v4646_v38  ;;  %v2000_v17 = vadd.f32 %v5642_v53, %v5641_v15  ;;  %v5647_v15 = vld [vmem:[#allocation8_spill] sm:$0xff] }
 0x262   : > { %v2736_v54 = vpop.f32.mrf.mxu2  ;;  %v2814_v39 = vpop.f32.mrf.mxu3  ;;  %v2004_v53 = vadd.f32 %v5174_v11, %v5647_v15 }
 0x263   : > { %v3038_v16 = vadd.f32 %v2736_v54, %v1971_v21  ;;  %v3064_v29 = vadd.f32 %v2814_v39, %v1997_v3  ;;  %v3992_v39 = vld [vmem:[%s4284_s24 + $0x338] sm:$0xff] }
 0x265   : > { %v3354_v44 = vadd.f32 %v5184_v18, %v3038_v16  ;;  %v3380_v8 = vadd.f32 %v5184_v18, %v3064_v29  ;;  %v4018_v16 = vld [vmem:[%s4284_s24 + $0x408] sm:$0xff] }
 0x266   : > { %v813_v35 = vpop.f32.mrf.mxu0  ;;  %v1672_v20 = vpop.f32.mrf.mxu1 }
 0x267   : > { %3458 = vst [vmem:[%s4540_s12 + $0x1c8] sm:$0xff] %v3354_v44  ;;  %4094 = vmatmul.msk.f32.gmra.mxu2 %vm305_vm1, %v3989_v51  ;;  %4120 = vmatmul.msk.f32.gmra.mxu3 %vm305_vm1, %v4015_v41  ;;  %v1972_v33 = vadd.f32 %v1672_v20, %v813_v35 }
 0x268   : > { %3484 = vst [vmem:[%s4540_s12 + $0x298] sm:$0xff] %v3380_v8  ;;  %v5644_v8 = vld [vmem:[#allocation24_spill] sm:$0xff] }
 0x269   : > { %3676 = vmatmul.msk.f32.gmra.mxu0 %vm305_vm1, %v5065_v2  ;;  %3885 = vmatmul.msk.f32.gmra.mxu1 %vm305_vm1, %v5274_v7  ;;  %v5639_v7 = vld [vmem:[#allocation3_spill] sm:$0xff] }
 0x26a   : > { %v2739_v59 = vpop.f32.mrf.mxu2  ;;  %v2817_v61 = vpop.f32.mrf.mxu3  ;;  %v1999_v57 = vadd.f32 %v5640_v24, %v5639_v7 }
 0x26b   : > { %v3039_v42 = vadd.f32 %v2739_v59, %v1972_v33  ;;  %v3065_v32 = vadd.f32 %v2817_v61, %v1998_v5 }
 0x26d   : > { %v3355_v62 = vadd.f32 %v5184_v18, %v3039_v42  ;;  %v3381_v52 = vadd.f32 %v5184_v18, %v3065_v32 }
 0x26e   : > { %v816_v38 = vpop.f32.mrf.mxu0  ;;  %v1675_v2 = vpop.f32.mrf.mxu1 }
 0x26f   : > { %3459 = vst [vmem:[%s4540_s12 + $0x1d0] sm:$0xff] %v3355_v62  ;;  %4095 = vmatmul.msk.f32.gmra.mxu2 %vm305_vm1, %v3990_v22  ;;  %4121 = vmatmul.msk.f32.gmra.mxu3 %vm305_vm1, %v4016_v63  ;;  %v1973_v49 = vadd.f32 %v1675_v2, %v816_v38  ;;  %v5645_v62 = vld [vmem:[#allocation6_spill] sm:$0xff] }
 0x270   : > { %3485 = vst [vmem:[%s4540_s12 + $0x2a0] sm:$0xff] %v3381_v52 }
 0x271   : > { %3677 = vmatmul.msk.f32.gmra.mxu0 %vm305_vm1, %v5083_v58  ;;  %3886 = vmatmul.msk.f32.gmra.mxu1 %vm305_vm1, %v5289_v9 }
 0x272   : > { %v2742_v36 = vpop.f32.mrf.mxu2  ;;  %v2820_v10 = vpop.f32.mrf.mxu3 }
 0x273   : > { %v3040_v30 = vadd.f32 %v2742_v36, %v1973_v49  ;;  %v3066_v60 = vadd.f32 %v2820_v10, %v1999_v57  ;;  %v5646_v10 = vld [vmem:[#allocation7_spill] sm:$0xff] }
 0x275   : > { %v3356_v6 = vadd.f32 %v5184_v18, %v3040_v30  ;;  %v3382_v26 = vadd.f32 %v5184_v18, %v3066_v60  ;;  %v2003_v30 = vadd.f32 %v5159_v25, %v5646_v10 }
 0x276   : > { %v819_v47 = vpop.f32.mrf.mxu0  ;;  %v1678_v58 = vpop.f32.mrf.mxu1 }
 0x277   : > { %3460 = vst [vmem:[%s4540_s12 + $0x1d8] sm:$0xff] %v3356_v6  ;;  %4096 = vmatmul.msk.f32.gmra.mxu2 %vm305_vm1, %v3991_v27  ;;  %4122 = vmatmul.msk.f32.gmra.mxu3 %vm305_vm1, %v4017_v4  ;;  %v1974_v9 = vadd.f32 %v1678_v58, %v819_v47 }
 0x278   : > { %3486 = vst [vmem:[%s4540_s12 + $0x2a8] sm:$0xff] %v3382_v26 }
 0x279   : > { %3678 = vmatmul.msk.f32.gmra.mxu0 %vm305_vm1, %v5101_v34  ;;  %3887 = vmatmul.msk.f32.gmra.mxu1 %vm305_vm1, %v5304_v19  ;;  %v5643_v19 = vld [vmem:[#allocation5_spill] sm:$0xff] }
 0x27a   : > { %v2745_v28 = vpop.f32.mrf.mxu2  ;;  %v2823_v21 = vpop.f32.mrf.mxu3  ;;  %v2001_v35 = vadd.f32 %v5644_v8, %v5643_v19 }
 0x27b   : > { %v3041_v3 = vadd.f32 %v2745_v28, %v1974_v9  ;;  %v3067_v54 = vadd.f32 %v2823_v21, %v2000_v17 }
 0x27d   : > { %v3357_v29 = vadd.f32 %v5184_v18, %v3041_v3  ;;  %v3383_v51 = vadd.f32 %v5184_v18, %v3067_v54 }
 0x27e   : > { %v822_v41 = vpop.f32.mrf.mxu0  ;;  %v1681_v34 = vpop.f32.mrf.mxu1 }
 0x27f   : > { %3461 = vst [vmem:[%s4540_s12 + $0x1e0] sm:$0xff] %v3357_v29  ;;  %4097 = vmatmul.msk.f32.gmra.mxu2 %vm305_vm1, %v3992_v39  ;;  %4123 = vmatmul.msk.f32.gmra.mxu3 %vm305_vm1, %v4018_v16  ;;  %v1975_v44 = vadd.f32 %v1681_v34, %v822_v41 }
 0x280   : > { %3487 = vst [vmem:[%s4540_s12 + $0x2b0] sm:$0xff] %v3383_v51  ;;  %v5648_v51 = vld [vmem:[#allocation9_spill] sm:$0xff] }
 0x281   : > { %3679 = vmatmul.msk.f32.gmra.mxu0 %vm305_vm1, %v5119_v45  ;;  %3888 = vmatmul.msk.f32.gmra.mxu1 %vm305_vm1, %v5319_v31  ;;  %v2002_v45 = vadd.f32 %v5144_v46, %v5645_v62  ;;  %v2005_v41 = vadd.f32 %v5194_v56, %v5648_v51 }
 0x282   : > { %v2748_v20 = vpop.f32.mrf.mxu2  ;;  %v2826_v33 = vpop.f32.mrf.mxu3 }
 0x283   : > { %v3042_v5 = vadd.f32 %v2748_v20, %v1975_v44  ;;  %v3068_v59 = vadd.f32 %v2826_v33, %v2001_v35 }
 0x285   : > { %v3358_v61 = vadd.f32 %v5184_v18, %v3042_v5  ;;  %v3384_v42 = vadd.f32 %v5184_v18, %v3068_v59  ;;  %v5649_v59 = vld [vmem:[#allocation10_spill] sm:$0xff] }
 0x286   : > { %v825_v32 = vpop.f32.mrf.mxu0  ;;  %v1684_v22 = vpop.f32.mrf.mxu1 }
 0x287   : > { %3462 = vst [vmem:[%s4540_s12 + $0x1e8] sm:$0xff] %v3358_v61  ;;  %v1976_v63 = vadd.f32 %v1684_v22, %v825_v32  ;;  %v2006_v61 = vadd.f32 %v5209_v55, %v5649_v59  ;;  %v5654_v59 = vld [vmem:[#allocation15_spill] sm:$0xff] }
 0x288   : > { %3488 = vst [vmem:[%s4540_s12 + $0x2b8] sm:$0xff] %v3384_v42 }
 0x28a   : > { %v2751_v52 = vpop.f32.mrf.mxu2  ;;  %v2829_v38 = vpop.f32.mrf.mxu3 }
 0x28b   : > { %v3043_v2 = vadd.f32 %v2751_v52, %v1976_v63  ;;  %v3069_v31 = vadd.f32 %v2829_v38, %v2002_v45 }
 0x28d   : > { %v3359_v49 = vadd.f32 %v5184_v18, %v3043_v2  ;;  %v3385_v7 = vadd.f32 %v5184_v18, %v3069_v31  ;;  %v5650_v2 = vld [vmem:[#allocation11_spill] sm:$0xff] }
 0x28e   : > { %v828_v24 = vpop.f32.mrf.mxu0  ;;  %v1687_v57 = vpop.f32.mrf.mxu1  ;;  %v2007_v31 = vadd.f32 %v5224_v48, %v5650_v2 }
 0x28f   : > { %3463 = vst [vmem:[%s4540_s12 + $0x1f0] sm:$0xff] %v3359_v49  ;;  %v1977_v36 = vadd.f32 %v1687_v57, %v828_v24 }
 0x290   : > { %3489 = vst [vmem:[%s4540_s12 + $0x2c0] sm:$0xff] %v3385_v7 }
 0x292   : > { %v2754_v60 = vpop.f32.mrf.mxu2  ;;  %v2832_v46 = vpop.f32.mrf.mxu3 }
 0x293   : > { %v3044_v27 = vadd.f32 %v2754_v60, %v1977_v36  ;;  %v3070_v4 = vadd.f32 %v2832_v46, %v2003_v30  ;;  %v5651_v46 = vld [vmem:[#allocation12_spill] sm:$0xff] }
 0x295   : > { %v3360_v6 = vadd.f32 %v5184_v18, %v3044_v27  ;;  %v3386_v26 = vadd.f32 %v5184_v18, %v3070_v4  ;;  %v2008_v27 = vadd.f32 %v5239_v14, %v5651_v46 }
 0x296   : > { %v831_v47 = vpop.f32.mrf.mxu0  ;;  %v1690_v58 = vpop.f32.mrf.mxu1 }
 0x297   : > { %3464 = vst [vmem:[%s4540_s12 + $0x1f8] sm:$0xff] %v3360_v6  ;;  %v1978_v9 = vadd.f32 %v1690_v58, %v831_v47 }
 0x298   : > { %3490 = vst [vmem:[%s4540_s12 + $0x2c8] sm:$0xff] %v3386_v26 }
 0x29a   : > { %v2757_v17 = vpop.f32.mrf.mxu2  ;;  %v2835_v25 = vpop.f32.mrf.mxu3 }
 0x29b   : > { %v3045_v28 = vadd.f32 %v2757_v17, %v1978_v9  ;;  %v3071_v21 = vadd.f32 %v2835_v25, %v2004_v53  ;;  %v5652_v17 = vld [vmem:[#allocation13_spill] sm:$0xff] }
 0x29c   : > { %v2009_v25 = vadd.f32 %v5254_v37, %v5652_v17 }
 0x29d   : > { %v3361_v3 = vadd.f32 %v5184_v18, %v3045_v28  ;;  %v3387_v54 = vadd.f32 %v5184_v18, %v3071_v21 }
 0x29e   : > { %v834_v39 = vpop.f32.mrf.mxu0  ;;  %v1693_v16 = vpop.f32.mrf.mxu1 }
 0x29f   : > { %3465 = vst [vmem:[%s4540_s12 + $0x200] sm:$0xff] %v3361_v3  ;;  %v1979_v29 = vadd.f32 %v1693_v16, %v834_v39 }
 0x2a0   : > { %3491 = vst [vmem:[%s4540_s12 + $0x2d0] sm:$0xff] %v3387_v54 }
 0x2a2   : > { %v2760_v34 = vpop.f32.mrf.mxu2  ;;  %v2838_v11 = vpop.f32.mrf.mxu3 }
 0x2a3   : > { %v3046_v44 = vadd.f32 %v2760_v34, %v1979_v29  ;;  %v3072_v19 = vadd.f32 %v2838_v11, %v2005_v41  ;;  %v5653_v41 = vld [vmem:[#allocation14_spill] sm:$0xff] }
 0x2a4   : > { %v2010_v34 = vadd.f32 %v5269_v43, %v5653_v41 }
 0x2a5   : > { %v3362_v8 = vadd.f32 %v5184_v18, %v3046_v44  ;;  %v3388_v35 = vadd.f32 %v5184_v18, %v3072_v19 }
 0x2a6   : > { %v837_v20 = vpop.f32.mrf.mxu0  ;;  %v1696_v33 = vpop.f32.mrf.mxu1 }
 0x2a7   : > { %3466 = vst [vmem:[%s4540_s12 + $0x208] sm:$0xff] %v3362_v8  ;;  %v1980_v5 = vadd.f32 %v1696_v33, %v837_v20 }
 0x2a8   : > { %3492 = vst [vmem:[%s4540_s12 + $0x2d8] sm:$0xff] %v3388_v35 }
 0x2aa   : > { %v2763_v42 = vpop.f32.mrf.mxu2  ;;  %v2841_v56 = vpop.f32.mrf.mxu3 }
 0x2ab   : > { %v3047_v32 = vadd.f32 %v2763_v42, %v1980_v5  ;;  %v3073_v22 = vadd.f32 %v2841_v56, %v2006_v61  ;;  %v2011_v61 = vadd.f32 %v5284_v0, %v5654_v59 }
 0x2ad   : > { %v3363_v63 = vadd.f32 %v5184_v18, %v3047_v32  ;;  %v3389_v62 = vadd.f32 %v5184_v18, %v3073_v22 }
 0x2ae   : > { %v840_v45 = vpop.f32.mrf.mxu0  ;;  %v1699_v52 = vpop.f32.mrf.mxu1 }
 0x2af   : > { %3467 = vst [vmem:[%s4540_s12 + $0x210] sm:$0xff] %v3363_v63  ;;  %v1981_v38 = vadd.f32 %v1699_v52, %v840_v45 }
 0x2b0   : > { %3493 = vst [vmem:[%s4540_s12 + $0x2e0] sm:$0xff] %v3389_v62 }
 0x2b2   : > { %v2766_v49 = vpop.f32.mrf.mxu2  ;;  %v2844_v55 = vpop.f32.mrf.mxu3 }
 0x2b3   : > { %v3048_v7 = vadd.f32 %v2766_v49, %v1981_v38  ;;  %v3074_v24 = vadd.f32 %v2844_v55, %v2007_v31  ;;  %v5655_v38 = vld [vmem:[#allocation16_spill] sm:$0xff] }
 0x2b4   : > { %v2012_v2 = vadd.f32 %v5299_v12, %v5655_v38 }
 0x2b5   : > { %v3364_v57 = vadd.f32 %v5184_v18, %v3048_v7  ;;  %v3390_v36 = vadd.f32 %v5184_v18, %v3074_v24 }
 0x2b6   : > { %v843_v10 = vpop.f32.mrf.mxu0  ;;  %v1702_v30 = vpop.f32.mrf.mxu1 }
 0x2b7   : > { %3468 = vst [vmem:[%s4540_s12 + $0x218] sm:$0xff] %v3364_v57  ;;  %v1982_v60 = vadd.f32 %v1702_v30, %v843_v10  ;;  %v5656_v30 = vld [vmem:[#allocation17_spill] sm:$0xff] }
 0x2b8   : > { %3494 = vst [vmem:[%s4540_s12 + $0x2e8] sm:$0xff] %v3390_v36 }
 0x2ba   : > { %v2769_v4 = vpop.f32.mrf.mxu2  ;;  %v2847_v48 = vpop.f32.mrf.mxu3 }
 0x2bb   : > { %v3049_v6 = vadd.f32 %v2769_v4, %v1982_v60  ;;  %v3075_v26 = vadd.f32 %v2847_v48, %v2008_v27  ;;  %v2013_v60 = vadd.f32 %v5314_v13, %v5656_v30 }
 0x2bd   : > { %v3365_v47 = vadd.f32 %v5184_v18, %v3049_v6  ;;  %v3391_v58 = vadd.f32 %v5184_v18, %v3075_v26 }
 0x2be   : > { %v846_v9 = vpop.f32.mrf.mxu0  ;;  %v1705_v15 = vpop.f32.mrf.mxu1 }
 0x2bf   : > { %3469 = vst [vmem:[%s4540_s12 + $0x220] sm:$0xff] %v3365_v47  ;;  %v1983_v53 = vadd.f32 %v1705_v15, %v846_v9  ;;  %v5657_v9 = vld [vmem:[#allocation18_spill] sm:$0xff] }
 0x2c0   : > { %3495 = vst [vmem:[%s4540_s12 + $0x2f0] sm:$0xff] %v3391_v58  ;;  %v2014_v15 = vadd.f32 %v5329_v40, %v5657_v9 }
 0x2c2   : > { %v2772_v28 = vpop.f32.mrf.mxu2  ;;  %v2850_v14 = vpop.f32.mrf.mxu3 }
 0x2c3   : > { %v3050_v21 = vadd.f32 %v2772_v28, %v1983_v53  ;;  %v3076_v3 = vadd.f32 %v2850_v14, %v2009_v25 }
 0x2c5   : > { %v3366_v54 = vadd.f32 %v5184_v18, %v3050_v21  ;;  %v3392_v39 = vadd.f32 %v5184_v18, %v3076_v3 }
 0x2c6   : > { %v849_v16 = vpop.f32.mrf.mxu0  ;;  %v1708_v29 = vpop.f32.mrf.mxu1 }
 0x2c7   : > { %3470 = vst [vmem:[%s4540_s12 + $0x228] sm:$0xff] %v3366_v54  ;;  %v1984_v51 = vadd.f32 %v1708_v29, %v849_v16 }
 0x2c8   : > { %3496 = vst [vmem:[%s4540_s12 + $0x2f8] sm:$0xff] %v3392_v39  ;;  %v5658_v39 = vld [vmem:[#allocation19_spill] sm:$0xff] }
 0x2c9   : > { %v2015_v16 = vadd.f32 %v5341_v23, %v5658_v39 }
 0x2ca   : > { %v2775_v11 = vpop.f32.mrf.mxu2  ;;  %v2853_v37 = vpop.f32.mrf.mxu3 }
 0x2cb   : > { %v3051_v44 = vadd.f32 %v2775_v11, %v1984_v51  ;;  %v3077_v19 = vadd.f32 %v2853_v37, %v2010_v34  ;;  %v4169_v34 = vld [vmem:[%s5615_s2] ss:$0 sm:$0xff] }
 0x2cd   : > { %v3367_v8 = vadd.f32 %v5184_v18, %v3051_v44  ;;  %v3393_v35 = vadd.f32 %v5184_v18, %v3077_v19 }
 0x2ce   : > { %v852_v20 = vpop.f32.mrf.mxu0  ;;  %v1711_v33 = vpop.f32.mrf.mxu1 }
 0x2cf   : > { %3471 = vst [vmem:[%s4540_s12 + $0x230] sm:$0xff] %v3367_v8  ;;  %v1985_v5 = vadd.f32 %v1711_v33, %v852_v20  ;;  %v5659_v8 = vld [vmem:[#allocation20_spill] sm:$0xff] }
 0x2d0   : > { %3497 = vst [vmem:[%s4540_s12 + $0x300] sm:$0xff] %v3393_v35  ;;  %v2016_v23 = vadd.f32 %v5353_v1, %v5659_v8 }
 0x2d2   : > { %v2778_v42 = vpop.f32.mrf.mxu2  ;;  %v2856_v43 = vpop.f32.mrf.mxu3 }
 0x2d3   : > { %v3052_v56 = vadd.f32 %v2778_v42, %v1985_v5  ;;  %v3078_v32 = vadd.f32 %v2856_v43, %v2011_v61 }
 0x2d5   : > { %v3368_v22 = vadd.f32 %v5184_v18, %v3052_v56  ;;  %v3394_v63 = vadd.f32 %v5184_v18, %v3078_v32  ;;  %v5660_v32 = vld [vmem:[#allocation21_spill] sm:$0xff] }
 0x2d6   : > { %v855_v62 = vpop.f32.mrf.mxu0  ;;  %v1714_v45 = vpop.f32.mrf.mxu1 }
 0x2d7   : > { %3472 = vst [vmem:[%s4540_s12 + $0x238] sm:$0xff] %v3368_v22  ;;  %v1986_v52 = vadd.f32 %v1714_v45, %v855_v62  ;;  %v2017_v22 = vadd.f32 %v5365_v50, %v5660_v32 }
 0x2d8   : > { %3498 = vst [vmem:[%s4540_s12 + $0x308] sm:$0xff] %v3394_v63 }
 0x2da   : > { %v2781_v31 = vpop.f32.mrf.mxu2  ;;  %v2859_v0 = vpop.f32.mrf.mxu3 }
 0x2db   : > { %v3053_v49 = vadd.f32 %v2781_v31, %v1986_v52  ;;  %v3079_v55 = vadd.f32 %v2859_v0, %v2012_v2 }
 0x2dd   : > { %v3369_v7 = vadd.f32 %v5184_v18, %v3053_v49  ;;  %v3395_v24 = vadd.f32 %v5184_v18, %v3079_v55 }
 0x2de   : > { %v858_v57 = vpop.f32.mrf.mxu0  ;;  %v1717_v36 = vpop.f32.mrf.mxu1 }
 0x2df   : > { %3473 = vst [vmem:[%s4540_s12 + $0x240] sm:$0xff] %v3369_v7  ;;  %v1987_v10 = vadd.f32 %v1717_v36, %v858_v57 }
 0x2e0   : > { %3499 = vst [vmem:[%s4540_s12 + $0x310] sm:$0xff] %v3395_v24 }
 0x2e2   : > { %v2784_v46 = vpop.f32.mrf.mxu2  ;;  %v2862_v12 = vpop.f32.mrf.mxu3 }
 0x2e3   : > { %v3054_v27 = vadd.f32 %v2784_v46, %v1987_v10  ;;  %v3080_v4 = vadd.f32 %v2862_v12, %v2013_v60 }
 0x2e5   : > { %v3370_v48 = vadd.f32 %v5184_v18, %v3054_v27  ;;  %v3396_v6 = vadd.f32 %v5184_v18, %v3080_v4 }
 0x2e6   : > { %v861_v26 = vpop.f32.mrf.mxu0  ;;  %v1720_v47 = vpop.f32.mrf.mxu1 }
 0x2e7   : > { %3474 = vst [vmem:[%s4540_s12 + $0x248] sm:$0xff] %v3370_v48  ;;  %v1988_v58 = vadd.f32 %v1720_v47, %v861_v26 }
 0x2e8   : > { %3500 = vst [vmem:[%s4540_s12 + $0x318] sm:$0xff] %v3396_v6 }
 0x2ea   : > { %v2787_v53 = vpop.f32.mrf.mxu2  ;;  %v2865_v13 = vpop.f32.mrf.mxu3 }
 0x2eb   : > { %v3055_v17 = vadd.f32 %v2787_v53, %v1988_v58  ;;  %v3081_v25 = vadd.f32 %v2865_v13, %v2014_v15 }
 0x2ed   : > { %v3371_v28 = vadd.f32 %v5184_v18, %v3055_v17  ;;  %v3397_v14 = vadd.f32 %v5184_v18, %v3081_v25 }
 0x2ee   : > { %v864_v21 = vpop.f32.mrf.mxu0  ;;  %v1723_v3 = vpop.f32.mrf.mxu1 }
 0x2ef   : > { %3475 = vst [vmem:[%s4540_s12 + $0x250] sm:$0xff] %v3371_v28  ;;  %v1989_v54 = vadd.f32 %v1723_v3, %v864_v21 }
 0x2f0   : > { %3501 = vst [vmem:[%s4540_s12 + $0x320] sm:$0xff] %v3397_v14 }
 0x2f2   : > { %v2790_v29 = vpop.f32.mrf.mxu2  ;;  %v2868_v40 = vpop.f32.mrf.mxu3 }
 0x2f3   : > { %v3056_v51 = vadd.f32 %v2790_v29, %v1989_v54  ;;  %v3082_v41 = vadd.f32 %v2868_v40, %v2015_v16 }
 0x2f5   : > { %v3372_v11 = vadd.f32 %v4169_v34, %v3056_v51  ;;  %v3398_v18 = vadd.f32 %v4169_v34, %v3082_v41 }
 0x2f6   : > { %v867_v37 = vpop.f32.mrf.mxu0  ;;  %v1726_v44 = vpop.f32.mrf.mxu1 }
 0x2f7   : > { %3476 = vst [vmem:[%s4540_s12 + $0x258] sm:$0xff] %v3372_v11  ;;  %v1990_v19 = vadd.f32 %v1726_v44, %v867_v37 }
 0x2f8   : > { %3502 = vst [vmem:[%s4540_s12 + $0x328] sm:$0xff] %v3398_v18 }
 0x2fa   : > { %v2793_v35 = vpop.f32.mrf.mxu2  ;;  %v2871_v20 = vpop.f32.mrf.mxu3 }
 0x2fb   : > { %v3057_v33 = vadd.f32 %v2793_v35, %v1990_v19  ;;  %v3083_v5 = vadd.f32 %v2871_v20, %v2016_v23 }
 0x2fd   : > { %v3373_v59 = vadd.f32 %v4169_v34, %v3057_v33  ;;  %v3399_v61 = vadd.f32 %v4169_v34, %v3083_v5 }
 0x2fe   : > { %v870_v42 = vpop.f32.mrf.mxu0  ;;  %v1729_v43 = vpop.f32.mrf.mxu1 }
 0x2ff   : > { %3477 = vst [vmem:[%s4540_s12 + $0x260] sm:$0xff] %v3373_v59  ;;  %v1991_v56 = vadd.f32 %v1729_v43, %v870_v42 }
 0x300   : > { %3503 = vst [vmem:[%s4540_s12 + $0x330] sm:$0xff] %v3399_v61 }
 0x302   : > { %v2796_v63 = vpop.f32.mrf.mxu2  ;;  %v2874_v62 = vpop.f32.mrf.mxu3 }
 0x303   : > { %v3058_v45 = vadd.f32 %v2796_v63, %v1991_v56  ;;  %v3084_v1 = vadd.f32 %v2874_v62, %v2017_v22 }
 0x305   : > { %v3374_v52 = vadd.f32 %v4169_v34, %v3058_v45  ;;  %v3400_v38 = vadd.f32 %v4169_v34, %v3084_v1 }
 0x307   : > { %3478 = vst [vmem:[%s4540_s12 + $0x268] sm:$0xff] %v3374_v52 }
 0x308   : > { %3504 = vst [vmem:[%s4540_s12 + $0x338] sm:$0xff] %v3400_v38 }
 0x309 PF: > { %s13_s14 = sadd.s32 1, %s4192_s14   ;;  %s5661_s12 = smov %s4188_s13 }
 0x30a   : > { %p10_p5 = scmp.ge.s32.totalorder %s13_s14, 4   ;;  %s5662_s13 = smov %s5664_s15 }
 0x30c   :  { %12 = sbr.rel (!%p10_p5) target bundleno = 2 (0x2), region = 65 }

</bundles_post_ra>
